<compile_context>
chip_gen: v7x
topology: tpu7x:2x2x1
jax: 0.10.0
libtpu: 0.0.40
codegen_flags: <defaults>
</compile_context>

<pallas_src>
import math
import functools

import jax
import jax.numpy as jnp
from jax import lax
from jax.experimental import pallas as pl
from jax.experimental.pallas import tpu as pltpu


def _mhsa_kernel(x_ref, w_qkv_ref, b_qkv_ref, wf_ref, bf_ref, *out_refs,
                 num_head, head_dim, model_dim, seq_len, batch_block,
                 compute_dtype, emit_prob):
    if emit_prob:
        prob_ref, out_ref = out_refs
    else:
        (out_ref,) = out_refs

    m_rows = batch_block * seq_len
    # (Bb, seq, D) -> (Bb*seq, D): leading-dim merge (layout-free for seq % 8 == 0).
    x2 = x_ref[...].reshape(m_rows, model_dim)

    # One wide QKV projection for the whole batch block: (Bb*seq, D) @ (D, 3D),
    # f32 accumulation regardless of the (possibly bf16) input dtype.
    qkv = jnp.dot(x2, w_qkv_ref[...], preferred_element_type=jnp.float32)
    qkv = qkv + b_qkv_ref[...]                                   # (Bb*seq, 3D) f32

    scale = 1.0 / math.sqrt(head_dim)

    row_blocks = []
    for lb in range(batch_block):                  # static: batch_block is small
        r0 = lb * seq_len
        r1 = r0 + seq_len
        head_outs = []
        # TODO(synk): for large num_head switch to lax.fori_loop writing into a
        #             VMEM scratch (bounds vreg live ranges); static unroll is
        #             fine for the small head counts used here.
        for h in range(num_head):
            lo = h * head_dim
            hi = lo + head_dim
            # Scale folded into q (seq*hd VALU ops instead of seq*seq).
            q = (qkv[r0:r1, lo:hi] * scale).astype(compute_dtype)
            k = qkv[r0:r1, model_dim + lo:model_dim + hi].astype(compute_dtype)
            v = qkv[r0:r1, 2 * model_dim + lo:2 * model_dim + hi].astype(compute_dtype)

            # q @ k^T via dot_general contracting last dims (no transpose
            # materialized); f32 accumulation.
            s = lax.dot_general(q, k, (((1,), (1,)), ((), ())),
                                preferred_element_type=jnp.float32)
            mx = jnp.max(s, axis=-1, keepdims=True)
            e = jnp.exp(s - mx)
            denom = jnp.sum(e, axis=-1, keepdims=True)
            # Exact reciprocal only on the (seq, 1) denominator (per review);
            # approx=True is a further EUP-slot win if tolerances allow.
            p = e * pl.reciprocal(denom)
            if emit_prob:
                prob_ref[lb * num_head + h] = p                  # (seq, seq) f32
            head_outs.append(jnp.dot(p.astype(compute_dtype), v,
                                     preferred_element_type=jnp.float32))
        row_blocks.append(jnp.concatenate(head_outs, axis=-1))    # (seq, D)

    if len(row_blocks) > 1:
        concat = jnp.concatenate(row_blocks, axis=0)              # (Bb*seq, D)
    else:
        concat = row_blocks[0]

    # One wide final linear for the whole block: (Bb*seq, D) @ (D, D).
    out = jnp.dot(concat.astype(compute_dtype), wf_ref[...],
                  preferred_element_type=jnp.float32) + bf_ref[...]
    out_ref[...] = out.reshape(batch_block, seq_len, model_dim).astype(out_ref.dtype)


def _pick_batch_block(bs, seq_len, target_rows=256):
    """Largest divisor of bs keeping the projection M-dim <= target_rows."""
    best = 1
    for bb in range(1, bs + 1):
        if bs % bb == 0 and bb * seq_len <= target_rows:
            best = bb
    return best


def multi_head_self_attention(x, params, num_head, *,
                              compute_dtype=jnp.float32,
                              emit_prob=True,
                              batch_block=None):
    """Pallas implementation of MultiHeadSelfAttention.forward (mask=None).

    compute_dtype: dtype of the MXU matmul inputs (f32 default; bf16 for
                   v6e/v7x throughput — accumulation is always f32).
    emit_prob:     also return the (bs*num_head, seq, seq) softmax probabilities
                   (matches the PyTorch module); disable to skip that HBM write.
    """
    w_proj, b_proj, w_final, b_final = params      # PyTorch Linear layouts
    bs, seq_len, model_dim = x.shape
    head_dim = model_dim // num_head

    if batch_block is None:
        batch_block = _pick_batch_block(bs, seq_len)
    assert bs % batch_block == 0

    # Matmul inputs are cast at the pallas_call boundary so DMA/VMEM footprint
    # also shrink in the bf16 path; biases stay f32 (added post-accumulation).
    x_in = x.astype(compute_dtype)
    w_qkv = w_proj.T.astype(compute_dtype)          # (D, 3D), cols [q | k | v]
    wf = w_final.T.astype(compute_dtype)            # (D, D)
    b_qkv = b_proj.reshape(1, 3 * model_dim).astype(jnp.float32)
    bf = b_final.reshape(1, model_dim).astype(jnp.float32)

    kernel = functools.partial(
        _mhsa_kernel, num_head=num_head, head_dim=head_dim,
        model_dim=model_dim, seq_len=seq_len, batch_block=batch_block,
        compute_dtype=compute_dtype, emit_prob=emit_prob)

    grid = (bs // batch_block,)

    out_shapes = []
    out_specs = []
    if emit_prob:
        out_shapes.append(jax.ShapeDtypeStruct(
            (bs * num_head, seq_len, seq_len), jnp.float32))
        out_specs.append(pl.BlockSpec(
            (batch_block * num_head, seq_len, seq_len), lambda b: (b, 0, 0)))
    out_shapes.append(jax.ShapeDtypeStruct((bs, seq_len, model_dim), jnp.float32))
    out_specs.append(pl.BlockSpec(
        (batch_block, seq_len, model_dim), lambda b: (b, 0, 0)))

    # Advisory cost estimate so XLA does not treat the custom call as free.
    flops = (2 * bs * seq_len * model_dim * 3 * model_dim
             + 4 * bs * num_head * seq_len * seq_len * head_dim
             + 2 * bs * seq_len * model_dim * model_dim)
    bytes_accessed = (x_in.size * x_in.dtype.itemsize
                      + w_qkv.size * w_qkv.dtype.itemsize
                      + wf.size * wf.dtype.itemsize
                      + b_qkv.size * b_qkv.dtype.itemsize
                      + bf.size * bf.dtype.itemsize
                      + bs * seq_len * model_dim * 4
                      + (bs * num_head * seq_len * seq_len * 4 if emit_prob else 0))
    cost = pl.CostEstimate(flops=int(flops),
                           transcendentals=int(bs * num_head * seq_len * seq_len),
                           bytes_accessed=int(bytes_accessed))

    def build(single_buffer_weights):
        # Weights/biases have constant index_maps (never re-fetched): single
        # buffering halves their VMEM footprint.
        const_kw = ({"pipeline_mode": pl.Buffered(1)}
                    if single_buffer_weights else {})
        in_specs = [
            pl.BlockSpec((batch_block, seq_len, model_dim), lambda b: (b, 0, 0)),
            pl.BlockSpec((model_dim, 3 * model_dim), lambda b: (0, 0), **const_kw),
            pl.BlockSpec((1, 3 * model_dim), lambda b: (0, 0), **const_kw),
            pl.BlockSpec((model_dim, model_dim), lambda b: (0, 0), **const_kw),
            pl.BlockSpec((1, model_dim), lambda b: (0, 0), **const_kw),
        ]
        return pl.pallas_call(
            kernel,
            out_shape=tuple(out_shapes),
            grid_spec=pltpu.PrefetchScalarGridSpec(
                num_scalar_prefetch=0,
                grid=grid,
                in_specs=in_specs,
                out_specs=out_specs),
            compiler_params=pltpu.CompilerParams(
                dimension_semantics=("parallel",),
                vmem_limit_bytes=32 * 1024 * 1024),
            cost_estimate=cost,
        )

    try:
        result = build(single_buffer_weights=True)(x_in, w_qkv, b_qkv, wf, bf)
    except Exception:
        # TODO(synk): this jax version rejected pipeline_mode=pl.Buffered(1);
        #             fall back to default double-buffered constant operands.
        result = build(single_buffer_weights=False)(x_in, w_qkv, b_qkv, wf, bf)

    if emit_prob:
        prob, out = result
        return prob, out
    (out,) = result
    return out


def mhsa_reference(x, params, num_head):
    """Pure-JAX reference mirroring the PyTorch forward (mask=None)."""
    w_proj, b_proj, w_final, b_final = params
    bs, seq_len, model_dim = x.shape
    head_dim = model_dim // num_head
    proj = jnp.einsum('bsd,ed->bse', x, w_proj) + b_proj
    q, k, v = jnp.split(proj, 3, axis=-1)

    def heads(t):
        return (t.reshape(bs, seq_len, num_head, head_dim)
                 .transpose(0, 2, 1, 3)
                 .reshape(bs * num_head, seq_len, head_dim))

    q, k, v = heads(q), heads(k), heads(v)
    scores = jnp.einsum('bqd,bkd->bqk', q, k) / math.sqrt(head_dim)
    prob = jax.nn.softmax(scores, axis=-1)
    out = jnp.einsum('bqk,bkd->bqd', prob, v)
    out = (out.reshape(bs, num_head, seq_len, head_dim)
              .transpose(0, 2, 1, 3)
              .reshape(bs, seq_len, model_dim))
    out = jnp.einsum('bsd,ed->bse', out, w_final) + b_final
    return prob, out


if __name__ == "__main__":
    bs, seq_len, model_dim, num_head = 2, 8, 32, 4

    key = jax.random.PRNGKey(0)
    kx, kwp, kbp, kwf, kbf = jax.random.split(key, 5)

    x = jax.random.normal(kx, (bs, seq_len, model_dim), dtype=jnp.float32)

    bound_p = 1.0 / math.sqrt(model_dim)
    w_proj = jax.random.uniform(kwp, (3 * model_dim, model_dim),
                                minval=-bound_p, maxval=bound_p,
                                dtype=jnp.float32)
    b_proj = jax.random.uniform(kbp, (3 * model_dim,),
                                minval=-bound_p, maxval=bound_p,
                                dtype=jnp.float32)
    w_final = jax.random.uniform(kwf, (model_dim, model_dim),
                                 minval=-bound_p, maxval=bound_p,
                                 dtype=jnp.float32)
    b_final = jax.random.uniform(kbf, (model_dim,),
                                 minval=-bound_p, maxval=bound_p,
                                 dtype=jnp.float32)
    params = (w_proj, b_proj, w_final, b_final)

    prob_ref, out_ref = mhsa_reference(x, params, num_head)

    # 1) f32 path (default): exact semantics, tight tolerances.
    prob, out = multi_head_self_attention(x, params, num_head)
    prob, out = jax.block_until_ready((prob, out))
    assert prob.shape == (bs * num_head, seq_len, seq_len)
    assert out.shape == (bs, seq_len, model_dim)
    assert jnp.allclose(prob, prob_ref, atol=1e-5, rtol=1e-5)
    assert jnp.allclose(out, out_ref, atol=1e-4, rtol=1e-4)

    # 2) output-only path (skips the prob HBM writeback).
    out_only = multi_head_self_attention(x, params, num_head, emit_prob=False)
    out_only = jax.block_until_ready(out_only)
    assert jnp.allclose(out_only, out_ref, atol=1e-4, rtol=1e-4)

    # 3) bf16 MXU-input / f32-accumulate path (v6e/v7x throughput lever);
    #    tolerances relaxed accordingly.
    prob_bf, out_bf = multi_head_self_attention(
        x, params, num_head, compute_dtype=jnp.bfloat16)
    prob_bf, out_bf = jax.block_until_ready((prob_bf, out_bf))
    assert jnp.allclose(prob_bf, prob_ref, atol=2e-2, rtol=2e-2)
    assert jnp.allclose(out_bf, out_ref, atol=5e-2, rtol=5e-2)

    print("KERNEL_OK")
</pallas_src>

<mosaic_0001>
module attributes {stable_mosaic.version = 11 : i64} {
  func.func @_mhsa_kernel(%arg0: i32, %arg1: memref<2x8x32xf32, #tpu.memory_space<vmem>>, %arg2: memref<32x96xf32, #tpu.memory_space<vmem>>, %arg3: memref<1x96xf32, #tpu.memory_space<vmem>>, %arg4: memref<32x32xf32, #tpu.memory_space<vmem>>, %arg5: memref<1x32xf32, #tpu.memory_space<vmem>>, %arg6: memref<8x8x8xf32, #tpu.memory_space<vmem>>, %arg7: memref<2x8x32xf32, #tpu.memory_space<vmem>>) attributes {dimension_semantics = [#tpu.dimension_semantics<parallel>], iteration_bounds = array<i64: 1>, scalar_prefetch = 0 : i64, scratch_operands = 0 : i64, tpu.core_type = #tpu.core_type<tc>, window_params = [{transform_indices = @transform_0, window_bounds = array<i64: 2, 8, 32>}, {pipeline_mode = #tpu.pipeline_mode<synchronous>, transform_indices = @transform_1, window_bounds = array<i64: 32, 96>}, {pipeline_mode = #tpu.pipeline_mode<synchronous>, transform_indices = @transform_2, window_bounds = array<i64: 1, 96>}, {pipeline_mode = #tpu.pipeline_mode<synchronous>, transform_indices = @transform_3, window_bounds = array<i64: 32, 32>}, {pipeline_mode = #tpu.pipeline_mode<synchronous>, transform_indices = @transform_4, window_bounds = array<i64: 1, 32>}, {transform_indices = @transform_5, window_bounds = array<i64: 8, 8, 8>}, {transform_indices = @transform_6, window_bounds = array<i64: 2, 8, 32>}]} {
    %c0 = arith.constant 0 : index
    %c0_0 = arith.constant 0 : index
    %c0_1 = arith.constant 0 : index
    %0 = vector.load %arg1[%c0, %c0_0, %c0_1] : memref<2x8x32xf32, #tpu.memory_space<vmem>>, vector<2x8x32xf32>
    %1 = vector.shape_cast %0 : vector<2x8x32xf32> to vector<16x32xf32>
    %c0_2 = arith.constant 0 : index
    %c0_3 = arith.constant 0 : index
    %2 = vector.load %arg2[%c0_2, %c0_3] : memref<32x96xf32, #tpu.memory_space<vmem>>, vector<32x96xf32>
    %cst = arith.constant dense<0.000000e+00> : vector<16x96xf32>
    %3 = tpu.matmul %1, %2, %cst {dimension_numbers = #tpu.dot_dimension_numbers<[1], [0], [0], [1], [0, 0, 1, 1], [], []>} : vector<16x32xf32>, vector<32x96xf32>, vector<16x96xf32> -> vector<16x96xf32>
    %c0_4 = arith.constant 0 : index
    %c0_5 = arith.constant 0 : index
    %4 = vector.load %arg3[%c0_4, %c0_5] : memref<1x96xf32, #tpu.memory_space<vmem>>, vector<1x96xf32>
    %5 = vector.broadcast %4 : vector<1x96xf32> to vector<16x96xf32>
    %6 = arith.addf %3, %5 : vector<16x96xf32>
    %7 = vector.extract_strided_slice %6 {offsets = [0, 0], sizes = [8, 8], strides = [1, 1]} : vector<16x96xf32> to vector<8x8xf32>
    %cst_6 = arith.constant 0.353553385 : f32
    %8 = vector.broadcast %cst_6 : f32 to vector<8x8xf32>
    %9 = arith.mulf %7, %8 : vector<8x8xf32>
    %10 = vector.extract_strided_slice %6 {offsets = [0, 32], sizes = [8, 8], strides = [1, 1]} : vector<16x96xf32> to vector<8x8xf32>
    %11 = vector.extract_strided_slice %6 {offsets = [0, 64], sizes = [8, 8], strides = [1, 1]} : vector<16x96xf32> to vector<8x8xf32>
    %cst_7 = arith.constant dense<0.000000e+00> : vector<8x8xf32>
    %12 = tpu.matmul %9, %10, %cst_7 {dimension_numbers = #tpu.dot_dimension_numbers<[1], [1], [0], [0], [0, 0, 1, 0], [], []>} : vector<8x8xf32>, vector<8x8xf32>, vector<8x8xf32> -> vector<8x8xf32>
    %cst_8 = arith.constant dense<0xFF800000> : vector<8xf32>
    %13 = vector.multi_reduction <maximumf>, %12, %cst_8 [1] : vector<8x8xf32> to vector<8xf32>
    %14 = vector.shape_cast %13 : vector<8xf32> to vector<8x1xf32>
    %15 = vector.broadcast %14 : vector<8x1xf32> to vector<8x8xf32>
    %16 = arith.subf %12, %15 : vector<8x8xf32>
    %17 = math.exp %16 : vector<8x8xf32>
    %cst_9 = arith.constant dense<0.000000e+00> : vector<8xf32>
    %18 = vector.multi_reduction <add>, %17, %cst_9 [1] : vector<8x8xf32> to vector<8xf32>
    %19 = vector.shape_cast %18 : vector<8xf32> to vector<8x1xf32>
    %20 = tpu.reciprocal %19 : vector<8x1xf32> -> vector<8x1xf32>
    %21 = vector.broadcast %20 : vector<8x1xf32> to vector<8x8xf32>
    %22 = arith.mulf %17, %21 : vector<8x8xf32>
    %c0_10 = arith.constant 0 : index
    %c0_11 = arith.constant 0 : index
    %c0_12 = arith.constant 0 : index
    %23 = vector.load %arg6[%c0_10, %c0_11, %c0_12] : memref<8x8x8xf32, #tpu.memory_space<vmem>>, vector<1x8x8xf32>
    %24 = vector.shape_cast %23 : vector<1x8x8xf32> to vector<8x8xf32>
    %25 = vector.shape_cast %22 : vector<8x8xf32> to vector<1x8x8xf32>
    tpu.vector_store %arg6[%c0_10, %c0_11, %c0_12], %25 {strides = array<i32>} : memref<8x8x8xf32, #tpu.memory_space<vmem>>, vector<1x8x8xf32>,
    %cst_13 = arith.constant dense<0.000000e+00> : vector<8x8xf32>
    %26 = tpu.matmul %22, %11, %cst_13 {dimension_numbers = #tpu.dot_dimension_numbers<[1], [0], [0], [1], [0, 0, 1, 1], [], []>} : vector<8x8xf32>, vector<8x8xf32>, vector<8x8xf32> -> vector<8x8xf32>
    %27 = vector.extract_strided_slice %6 {offsets = [0, 8], sizes = [8, 8], strides = [1, 1]} : vector<16x96xf32> to vector<8x8xf32>
    %cst_14 = arith.constant 0.353553385 : f32
    %28 = vector.broadcast %cst_14 : f32 to vector<8x8xf32>
    %29 = arith.mulf %27, %28 : vector<8x8xf32>
    %30 = vector.extract_strided_slice %6 {offsets = [0, 40], sizes = [8, 8], strides = [1, 1]} : vector<16x96xf32> to vector<8x8xf32>
    %31 = vector.extract_strided_slice %6 {offsets = [0, 72], sizes = [8, 8], strides = [1, 1]} : vector<16x96xf32> to vector<8x8xf32>
    %cst_15 = arith.constant dense<0.000000e+00> : vector<8x8xf32>
    %32 = tpu.matmul %29, %30, %cst_15 {dimension_numbers = #tpu.dot_dimension_numbers<[1], [1], [0], [0], [0, 0, 1, 0], [], []>} : vector<8x8xf32>, vector<8x8xf32>, vector<8x8xf32> -> vector<8x8xf32>
    %cst_16 = arith.constant dense<0xFF800000> : vector<8xf32>
    %33 = vector.multi_reduction <maximumf>, %32, %cst_16 [1] : vector<8x8xf32> to vector<8xf32>
    %34 = vector.shape_cast %33 : vector<8xf32> to vector<8x1xf32>
    %35 = vector.broadcast %34 : vector<8x1xf32> to vector<8x8xf32>
    %36 = arith.subf %32, %35 : vector<8x8xf32>
    %37 = math.exp %36 : vector<8x8xf32>
    %cst_17 = arith.constant dense<0.000000e+00> : vector<8xf32>
    %38 = vector.multi_reduction <add>, %37, %cst_17 [1] : vector<8x8xf32> to vector<8xf32>
    %39 = vector.shape_cast %38 : vector<8xf32> to vector<8x1xf32>
    %40 = tpu.reciprocal %39 : vector<8x1xf32> -> vector<8x1xf32>
    %41 = vector.broadcast %40 : vector<8x1xf32> to vector<8x8xf32>
    %42 = arith.mulf %37, %41 : vector<8x8xf32>
    %c1 = arith.constant 1 : index
    %c0_18 = arith.constant 0 : index
    %c0_19 = arith.constant 0 : index
    %43 = vector.load %arg6[%c1, %c0_18, %c0_19] : memref<8x8x8xf32, #tpu.memory_space<vmem>>, vector<1x8x8xf32>
    %44 = vector.shape_cast %43 : vector<1x8x8xf32> to vector<8x8xf32>
    %45 = vector.shape_cast %42 : vector<8x8xf32> to vector<1x8x8xf32>
    tpu.vector_store %arg6[%c1, %c0_18, %c0_19], %45 {strides = array<i32>} : memref<8x8x8xf32, #tpu.memory_space<vmem>>, vector<1x8x8xf32>,
    %cst_20 = arith.constant dense<0.000000e+00> : vector<8x8xf32>
    %46 = tpu.matmul %42, %31, %cst_20 {dimension_numbers = #tpu.dot_dimension_numbers<[1], [0], [0], [1], [0, 0, 1, 1], [], []>} : vector<8x8xf32>, vector<8x8xf32>, vector<8x8xf32> -> vector<8x8xf32>
    %47 = vector.extract_strided_slice %6 {offsets = [0, 16], sizes = [8, 8], strides = [1, 1]} : vector<16x96xf32> to vector<8x8xf32>
    %cst_21 = arith.constant 0.353553385 : f32
    %48 = vector.broadcast %cst_21 : f32 to vector<8x8xf32>
    %49 = arith.mulf %47, %48 : vector<8x8xf32>
    %50 = vector.extract_strided_slice %6 {offsets = [0, 48], sizes = [8, 8], strides = [1, 1]} : vector<16x96xf32> to vector<8x8xf32>
    %51 = vector.extract_strided_slice %6 {offsets = [0, 80], sizes = [8, 8], strides = [1, 1]} : vector<16x96xf32> to vector<8x8xf32>
    %cst_22 = arith.constant dense<0.000000e+00> : vector<8x8xf32>
    %52 = tpu.matmul %49, %50, %cst_22 {dimension_numbers = #tpu.dot_dimension_numbers<[1], [1], [0], [0], [0, 0, 1, 0], [], []>} : vector<8x8xf32>, vector<8x8xf32>, vector<8x8xf32> -> vector<8x8xf32>
    %cst_23 = arith.constant dense<0xFF800000> : vector<8xf32>
    %53 = vector.multi_reduction <maximumf>, %52, %cst_23 [1] : vector<8x8xf32> to vector<8xf32>
    %54 = vector.shape_cast %53 : vector<8xf32> to vector<8x1xf32>
    %55 = vector.broadcast %54 : vector<8x1xf32> to vector<8x8xf32>
    %56 = arith.subf %52, %55 : vector<8x8xf32>
    %57 = math.exp %56 : vector<8x8xf32>
    %cst_24 = arith.constant dense<0.000000e+00> : vector<8xf32>
    %58 = vector.multi_reduction <add>, %57, %cst_24 [1] : vector<8x8xf32> to vector<8xf32>
    %59 = vector.shape_cast %58 : vector<8xf32> to vector<8x1xf32>
    %60 = tpu.reciprocal %59 : vector<8x1xf32> -> vector<8x1xf32>
    %61 = vector.broadcast %60 : vector<8x1xf32> to vector<8x8xf32>
    %62 = arith.mulf %57, %61 : vector<8x8xf32>
    %c2 = arith.constant 2 : index
    %c0_25 = arith.constant 0 : index
    %c0_26 = arith.constant 0 : index
    %63 = vector.load %arg6[%c2, %c0_25, %c0_26] : memref<8x8x8xf32, #tpu.memory_space<vmem>>, vector<1x8x8xf32>
    %64 = vector.shape_cast %63 : vector<1x8x8xf32> to vector<8x8xf32>
    %65 = vector.shape_cast %62 : vector<8x8xf32> to vector<1x8x8xf32>
    tpu.vector_store %arg6[%c2, %c0_25, %c0_26], %65 {strides = array<i32>} : memref<8x8x8xf32, #tpu.memory_space<vmem>>, vector<1x8x8xf32>,
    %cst_27 = arith.constant dense<0.000000e+00> : vector<8x8xf32>
    %66 = tpu.matmul %62, %51, %cst_27 {dimension_numbers = #tpu.dot_dimension_numbers<[1], [0], [0], [1], [0, 0, 1, 1], [], []>} : vector<8x8xf32>, vector<8x8xf32>, vector<8x8xf32> -> vector<8x8xf32>
    %67 = vector.extract_strided_slice %6 {offsets = [0, 24], sizes = [8, 8], strides = [1, 1]} : vector<16x96xf32> to vector<8x8xf32>
    %cst_28 = arith.constant 0.353553385 : f32
    %68 = vector.broadcast %cst_28 : f32 to vector<8x8xf32>
    %69 = arith.mulf %67, %68 : vector<8x8xf32>
    %70 = vector.extract_strided_slice %6 {offsets = [0, 56], sizes = [8, 8], strides = [1, 1]} : vector<16x96xf32> to vector<8x8xf32>
    %71 = vector.extract_strided_slice %6 {offsets = [0, 88], sizes = [8, 8], strides = [1, 1]} : vector<16x96xf32> to vector<8x8xf32>
    %cst_29 = arith.constant dense<0.000000e+00> : vector<8x8xf32>
    %72 = tpu.matmul %69, %70, %cst_29 {dimension_numbers = #tpu.dot_dimension_numbers<[1], [1], [0], [0], [0, 0, 1, 0], [], []>} : vector<8x8xf32>, vector<8x8xf32>, vector<8x8xf32> -> vector<8x8xf32>
    %cst_30 = arith.constant dense<0xFF800000> : vector<8xf32>
    %73 = vector.multi_reduction <maximumf>, %72, %cst_30 [1] : vector<8x8xf32> to vector<8xf32>
    %74 = vector.shape_cast %73 : vector<8xf32> to vector<8x1xf32>
    %75 = vector.broadcast %74 : vector<8x1xf32> to vector<8x8xf32>
    %76 = arith.subf %72, %75 : vector<8x8xf32>
    %77 = math.exp %76 : vector<8x8xf32>
    %cst_31 = arith.constant dense<0.000000e+00> : vector<8xf32>
    %78 = vector.multi_reduction <add>, %77, %cst_31 [1] : vector<8x8xf32> to vector<8xf32>
    %79 = vector.shape_cast %78 : vector<8xf32> to vector<8x1xf32>
    %80 = tpu.reciprocal %79 : vector<8x1xf32> -> vector<8x1xf32>
    %81 = vector.broadcast %80 : vector<8x1xf32> to vector<8x8xf32>
    %82 = arith.mulf %77, %81 : vector<8x8xf32>
    %c3 = arith.constant 3 : index
    %c0_32 = arith.constant 0 : index
    %c0_33 = arith.constant 0 : index
    %83 = vector.load %arg6[%c3, %c0_32, %c0_33] : memref<8x8x8xf32, #tpu.memory_space<vmem>>, vector<1x8x8xf32>
    %84 = vector.shape_cast %83 : vector<1x8x8xf32> to vector<8x8xf32>
    %85 = vector.shape_cast %82 : vector<8x8xf32> to vector<1x8x8xf32>
    tpu.vector_store %arg6[%c3, %c0_32, %c0_33], %85 {strides = array<i32>} : memref<8x8x8xf32, #tpu.memory_space<vmem>>, vector<1x8x8xf32>,
    %cst_34 = arith.constant dense<0.000000e+00> : vector<8x8xf32>
    %86 = tpu.matmul %82, %71, %cst_34 {dimension_numbers = #tpu.dot_dimension_numbers<[1], [0], [0], [1], [0, 0, 1, 1], [], []>} : vector<8x8xf32>, vector<8x8xf32>, vector<8x8xf32> -> vector<8x8xf32>
    %87 = tpu.concatenate %26, %46, %66, %86 in 1 : vector<8x8xf32>, vector<8x8xf32>, vector<8x8xf32>, vector<8x8xf32> -> vector<8x32xf32>
    %88 = vector.extract_strided_slice %6 {offsets = [8, 0], sizes = [8, 8], strides = [1, 1]} : vector<16x96xf32> to vector<8x8xf32>
    %cst_35 = arith.constant 0.353553385 : f32
    %89 = vector.broadcast %cst_35 : f32 to vector<8x8xf32>
    %90 = arith.mulf %88, %89 : vector<8x8xf32>
    %91 = vector.extract_strided_slice %6 {offsets = [8, 32], sizes = [8, 8], strides = [1, 1]} : vector<16x96xf32> to vector<8x8xf32>
    %92 = vector.extract_strided_slice %6 {offsets = [8, 64], sizes = [8, 8], strides = [1, 1]} : vector<16x96xf32> to vector<8x8xf32>
    %cst_36 = arith.constant dense<0.000000e+00> : vector<8x8xf32>
    %93 = tpu.matmul %90, %91, %cst_36 {dimension_numbers = #tpu.dot_dimension_numbers<[1], [1], [0], [0], [0, 0, 1, 0], [], []>} : vector<8x8xf32>, vector<8x8xf32>, vector<8x8xf32> -> vector<8x8xf32>
    %cst_37 = arith.constant dense<0xFF800000> : vector<8xf32>
    %94 = vector.multi_reduction <maximumf>, %93, %cst_37 [1] : vector<8x8xf32> to vector<8xf32>
    %95 = vector.shape_cast %94 : vector<8xf32> to vector<8x1xf32>
    %96 = vector.broadcast %95 : vector<8x1xf32> to vector<8x8xf32>
    %97 = arith.subf %93, %96 : vector<8x8xf32>
    %98 = math.exp %97 : vector<8x8xf32>
    %cst_38 = arith.constant dense<0.000000e+00> : vector<8xf32>
    %99 = vector.multi_reduction <add>, %98, %cst_38 [1] : vector<8x8xf32> to vector<8xf32>
    %100 = vector.shape_cast %99 : vector<8xf32> to vector<8x1xf32>
    %101 = tpu.reciprocal %100 : vector<8x1xf32> -> vector<8x1xf32>
    %102 = vector.broadcast %101 : vector<8x1xf32> to vector<8x8xf32>
    %103 = arith.mulf %98, %102 : vector<8x8xf32>
    %c4 = arith.constant 4 : index
    %c0_39 = arith.constant 0 : index
    %c0_40 = arith.constant 0 : index
    %104 = vector.load %arg6[%c4, %c0_39, %c0_40] : memref<8x8x8xf32, #tpu.memory_space<vmem>>, vector<1x8x8xf32>
    %105 = vector.shape_cast %104 : vector<1x8x8xf32> to vector<8x8xf32>
    %106 = vector.shape_cast %103 : vector<8x8xf32> to vector<1x8x8xf32>
    tpu.vector_store %arg6[%c4, %c0_39, %c0_40], %106 {strides = array<i32>} : memref<8x8x8xf32, #tpu.memory_space<vmem>>, vector<1x8x8xf32>,
    %cst_41 = arith.constant dense<0.000000e+00> : vector<8x8xf32>
    %107 = tpu.matmul %103, %92, %cst_41 {dimension_numbers = #tpu.dot_dimension_numbers<[1], [0], [0], [1], [0, 0, 1, 1], [], []>} : vector<8x8xf32>, vector<8x8xf32>, vector<8x8xf32> -> vector<8x8xf32>
    %108 = vector.extract_strided_slice %6 {offsets = [8, 8], sizes = [8, 8], strides = [1, 1]} : vector<16x96xf32> to vector<8x8xf32>
    %cst_42 = arith.constant 0.353553385 : f32
    %109 = vector.broadcast %cst_42 : f32 to vector<8x8xf32>
    %110 = arith.mulf %108, %109 : vector<8x8xf32>
    %111 = vector.extract_strided_slice %6 {offsets = [8, 40], sizes = [8, 8], strides = [1, 1]} : vector<16x96xf32> to vector<8x8xf32>
    %112 = vector.extract_strided_slice %6 {offsets = [8, 72], sizes = [8, 8], strides = [1, 1]} : vector<16x96xf32> to vector<8x8xf32>
    %cst_43 = arith.constant dense<0.000000e+00> : vector<8x8xf32>
    %113 = tpu.matmul %110, %111, %cst_43 {dimension_numbers = #tpu.dot_dimension_numbers<[1], [1], [0], [0], [0, 0, 1, 0], [], []>} : vector<8x8xf32>, vector<8x8xf32>, vector<8x8xf32> -> vector<8x8xf32>
    %cst_44 = arith.constant dense<0xFF800000> : vector<8xf32>
    %114 = vector.multi_reduction <maximumf>, %113, %cst_44 [1] : vector<8x8xf32> to vector<8xf32>
    %115 = vector.shape_cast %114 : vector<8xf32> to vector<8x1xf32>
    %116 = vector.broadcast %115 : vector<8x1xf32> to vector<8x8xf32>
    %117 = arith.subf %113, %116 : vector<8x8xf32>
    %118 = math.exp %117 : vector<8x8xf32>
    %cst_45 = arith.constant dense<0.000000e+00> : vector<8xf32>
    %119 = vector.multi_reduction <add>, %118, %cst_45 [1] : vector<8x8xf32> to vector<8xf32>
    %120 = vector.shape_cast %119 : vector<8xf32> to vector<8x1xf32>
    %121 = tpu.reciprocal %120 : vector<8x1xf32> -> vector<8x1xf32>
    %122 = vector.broadcast %121 : vector<8x1xf32> to vector<8x8xf32>
    %123 = arith.mulf %118, %122 : vector<8x8xf32>
    %c5 = arith.constant 5 : index
    %c0_46 = arith.constant 0 : index
    %c0_47 = arith.constant 0 : index
    %124 = vector.load %arg6[%c5, %c0_46, %c0_47] : memref<8x8x8xf32, #tpu.memory_space<vmem>>, vector<1x8x8xf32>
    %125 = vector.shape_cast %124 : vector<1x8x8xf32> to vector<8x8xf32>
    %126 = vector.shape_cast %123 : vector<8x8xf32> to vector<1x8x8xf32>
    tpu.vector_store %arg6[%c5, %c0_46, %c0_47], %126 {strides = array<i32>} : memref<8x8x8xf32, #tpu.memory_space<vmem>>, vector<1x8x8xf32>,
    %cst_48 = arith.constant dense<0.000000e+00> : vector<8x8xf32>
    %127 = tpu.matmul %123, %112, %cst_48 {dimension_numbers = #tpu.dot_dimension_numbers<[1], [0], [0], [1], [0, 0, 1, 1], [], []>} : vector<8x8xf32>, vector<8x8xf32>, vector<8x8xf32> -> vector<8x8xf32>
    %128 = vector.extract_strided_slice %6 {offsets = [8, 16], sizes = [8, 8], strides = [1, 1]} : vector<16x96xf32> to vector<8x8xf32>
    %cst_49 = arith.constant 0.353553385 : f32
    %129 = vector.broadcast %cst_49 : f32 to vector<8x8xf32>
    %130 = arith.mulf %128, %129 : vector<8x8xf32>
    %131 = vector.extract_strided_slice %6 {offsets = [8, 48], sizes = [8, 8], strides = [1, 1]} : vector<16x96xf32> to vector<8x8xf32>
    %132 = vector.extract_strided_slice %6 {offsets = [8, 80], sizes = [8, 8], strides = [1, 1]} : vector<16x96xf32> to vector<8x8xf32>
    %cst_50 = arith.constant dense<0.000000e+00> : vector<8x8xf32>
    %133 = tpu.matmul %130, %131, %cst_50 {dimension_numbers = #tpu.dot_dimension_numbers<[1], [1], [0], [0], [0, 0, 1, 0], [], []>} : vector<8x8xf32>, vector<8x8xf32>, vector<8x8xf32> -> vector<8x8xf32>
    %cst_51 = arith.constant dense<0xFF800000> : vector<8xf32>
    %134 = vector.multi_reduction <maximumf>, %133, %cst_51 [1] : vector<8x8xf32> to vector<8xf32>
    %135 = vector.shape_cast %134 : vector<8xf32> to vector<8x1xf32>
    %136 = vector.broadcast %135 : vector<8x1xf32> to vector<8x8xf32>
    %137 = arith.subf %133, %136 : vector<8x8xf32>
    %138 = math.exp %137 : vector<8x8xf32>
    %cst_52 = arith.constant dense<0.000000e+00> : vector<8xf32>
    %139 = vector.multi_reduction <add>, %138, %cst_52 [1] : vector<8x8xf32> to vector<8xf32>
    %140 = vector.shape_cast %139 : vector<8xf32> to vector<8x1xf32>
    %141 = tpu.reciprocal %140 : vector<8x1xf32> -> vector<8x1xf32>
    %142 = vector.broadcast %141 : vector<8x1xf32> to vector<8x8xf32>
    %143 = arith.mulf %138, %142 : vector<8x8xf32>
    %c6 = arith.constant 6 : index
    %c0_53 = arith.constant 0 : index
    %c0_54 = arith.constant 0 : index
    %144 = vector.load %arg6[%c6, %c0_53, %c0_54] : memref<8x8x8xf32, #tpu.memory_space<vmem>>, vector<1x8x8xf32>
    %145 = vector.shape_cast %144 : vector<1x8x8xf32> to vector<8x8xf32>
    %146 = vector.shape_cast %143 : vector<8x8xf32> to vector<1x8x8xf32>
    tpu.vector_store %arg6[%c6, %c0_53, %c0_54], %146 {strides = array<i32>} : memref<8x8x8xf32, #tpu.memory_space<vmem>>, vector<1x8x8xf32>,
    %cst_55 = arith.constant dense<0.000000e+00> : vector<8x8xf32>
    %147 = tpu.matmul %143, %132, %cst_55 {dimension_numbers = #tpu.dot_dimension_numbers<[1], [0], [0], [1], [0, 0, 1, 1], [], []>} : vector<8x8xf32>, vector<8x8xf32>, vector<8x8xf32> -> vector<8x8xf32>
    %148 = vector.extract_strided_slice %6 {offsets = [8, 24], sizes = [8, 8], strides = [1, 1]} : vector<16x96xf32> to vector<8x8xf32>
    %cst_56 = arith.constant 0.353553385 : f32
    %149 = vector.broadcast %cst_56 : f32 to vector<8x8xf32>
    %150 = arith.mulf %148, %149 : vector<8x8xf32>
    %151 = vector.extract_strided_slice %6 {offsets = [8, 56], sizes = [8, 8], strides = [1, 1]} : vector<16x96xf32> to vector<8x8xf32>
    %152 = vector.extract_strided_slice %6 {offsets = [8, 88], sizes = [8, 8], strides = [1, 1]} : vector<16x96xf32> to vector<8x8xf32>
    %cst_57 = arith.constant dense<0.000000e+00> : vector<8x8xf32>
    %153 = tpu.matmul %150, %151, %cst_57 {dimension_numbers = #tpu.dot_dimension_numbers<[1], [1], [0], [0], [0, 0, 1, 0], [], []>} : vector<8x8xf32>, vector<8x8xf32>, vector<8x8xf32> -> vector<8x8xf32>
    %cst_58 = arith.constant dense<0xFF800000> : vector<8xf32>
    %154 = vector.multi_reduction <maximumf>, %153, %cst_58 [1] : vector<8x8xf32> to vector<8xf32>
    %155 = vector.shape_cast %154 : vector<8xf32> to vector<8x1xf32>
    %156 = vector.broadcast %155 : vector<8x1xf32> to vector<8x8xf32>
    %157 = arith.subf %153, %156 : vector<8x8xf32>
    %158 = math.exp %157 : vector<8x8xf32>
    %cst_59 = arith.constant dense<0.000000e+00> : vector<8xf32>
    %159 = vector.multi_reduction <add>, %158, %cst_59 [1] : vector<8x8xf32> to vector<8xf32>
    %160 = vector.shape_cast %159 : vector<8xf32> to vector<8x1xf32>
    %161 = tpu.reciprocal %160 : vector<8x1xf32> -> vector<8x1xf32>
    %162 = vector.broadcast %161 : vector<8x1xf32> to vector<8x8xf32>
    %163 = arith.mulf %158, %162 : vector<8x8xf32>
    %c7 = arith.constant 7 : index
    %c0_60 = arith.constant 0 : index
    %c0_61 = arith.constant 0 : index
    %164 = vector.load %arg6[%c7, %c0_60, %c0_61] : memref<8x8x8xf32, #tpu.memory_space<vmem>>, vector<1x8x8xf32>
    %165 = vector.shape_cast %164 : vector<1x8x8xf32> to vector<8x8xf32>
    %166 = vector.shape_cast %163 : vector<8x8xf32> to vector<1x8x8xf32>
    tpu.vector_store %arg6[%c7, %c0_60, %c0_61], %166 {strides = array<i32>} : memref<8x8x8xf32, #tpu.memory_space<vmem>>, vector<1x8x8xf32>,
    %cst_62 = arith.constant dense<0.000000e+00> : vector<8x8xf32>
    %167 = tpu.matmul %163, %152, %cst_62 {dimension_numbers = #tpu.dot_dimension_numbers<[1], [0], [0], [1], [0, 0, 1, 1], [], []>} : vector<8x8xf32>, vector<8x8xf32>, vector<8x8xf32> -> vector<8x8xf32>
    %168 = tpu.concatenate %107, %127, %147, %167 in 1 : vector<8x8xf32>, vector<8x8xf32>, vector<8x8xf32>, vector<8x8xf32> -> vector<8x32xf32>
    %169 = tpu.concatenate %87, %168 in 0 : vector<8x32xf32>, vector<8x32xf32> -> vector<16x32xf32>
    %c0_63 = arith.constant 0 : index
    %c0_64 = arith.constant 0 : index
    %170 = vector.load %arg4[%c0_63, %c0_64] : memref<32x32xf32, #tpu.memory_space<vmem>>, vector<32x32xf32>
    %cst_65 = arith.constant dense<0.000000e+00> : vector<16x32xf32>
    %171 = tpu.matmul %169, %170, %cst_65 {dimension_numbers = #tpu.dot_dimension_numbers<[1], [0], [0], [1], [0, 0, 1, 1], [], []>} : vector<16x32xf32>, vector<32x32xf32>, vector<16x32xf32> -> vector<16x32xf32>
    %c0_66 = arith.constant 0 : index
    %c0_67 = arith.constant 0 : index
    %172 = vector.load %arg5[%c0_66, %c0_67] : memref<1x32xf32, #tpu.memory_space<vmem>>, vector<1x32xf32>
    %173 = vector.broadcast %172 : vector<1x32xf32> to vector<16x32xf32>
    %174 = arith.addf %171, %173 : vector<16x32xf32>
    %175 = vector.shape_cast %174 : vector<16x32xf32> to vector<2x8x32xf32>
    %c0_68 = arith.constant 0 : index
    %c0_69 = arith.constant 0 : index
    %c0_70 = arith.constant 0 : index
    %176 = vector.load %arg7[%c0_68, %c0_69, %c0_70] : memref<2x8x32xf32, #tpu.memory_space<vmem>>, vector<2x8x32xf32>
    tpu.vector_store %arg7[%c0_68, %c0_69, %c0_70], %175 {strides = array<i32>} : memref<2x8x32xf32, #tpu.memory_space<vmem>>, vector<2x8x32xf32>,
    return
  }
  func.func @transform_0(%arg0: i32) -> (i32, i32, i32) {
    %c0_i32 = arith.constant 0 : i32
    %c0_i32_0 = arith.constant 0 : i32
    %c0_i32_1 = arith.constant 0 : i32
    return %arg0, %c0_i32, %c0_i32_0 : i32, i32, i32
  }
  func.func @transform_1(%arg0: i32) -> (i32, i32) {
    %c0_i32 = arith.constant 0 : i32
    %c0_i32_0 = arith.constant 0 : i32
    %c0_i32_1 = arith.constant 0 : i32
    return %c0_i32, %c0_i32_0 : i32, i32
  }
  func.func @transform_2(%arg0: i32) -> (i32, i32) {
    %c0_i32 = arith.constant 0 : i32
    %c0_i32_0 = arith.constant 0 : i32
    %c0_i32_1 = arith.constant 0 : i32
    return %c0_i32, %c0_i32_0 : i32, i32
  }
  func.func @transform_3(%arg0: i32) -> (i32, i32) {
    %c0_i32 = arith.constant 0 : i32
    %c0_i32_0 = arith.constant 0 : i32
    %c0_i32_1 = arith.constant 0 : i32
    return %c0_i32, %c0_i32_0 : i32, i32
  }
  func.func @transform_4(%arg0: i32) -> (i32, i32) {
    %c0_i32 = arith.constant 0 : i32
    %c0_i32_0 = arith.constant 0 : i32
    %c0_i32_1 = arith.constant 0 : i32
    return %c0_i32, %c0_i32_0 : i32, i32
  }
  func.func @transform_5(%arg0: i32) -> (i32, i32, i32) {
    %c0_i32 = arith.constant 0 : i32
    %c0_i32_0 = arith.constant 0 : i32
    %c0_i32_1 = arith.constant 0 : i32
    return %arg0, %c0_i32, %c0_i32_0 : i32, i32, i32
  }
  func.func @transform_6(%arg0: i32) -> (i32, i32, i32) {
    %c0_i32 = arith.constant 0 : i32
    %c0_i32_0 = arith.constant 0 : i32
    %c0_i32_1 = arith.constant 0 : i32
    return %arg0, %c0_i32, %c0_i32_0 : i32, i32, i32
  }
}

module attributes {stable_mosaic.version = 11 : i64} {
  func.func @_mhsa_kernel(%arg0: i32, %arg1: memref<2x8x32xf32, #tpu.memory_space<vmem>>, %arg2: memref<32x96xf32, #tpu.memory_space<vmem>>, %arg3: memref<1x96xf32, #tpu.memory_space<vmem>>, %arg4: memref<32x32xf32, #tpu.memory_space<vmem>>, %arg5: memref<1x32xf32, #tpu.memory_space<vmem>>, %arg6: memref<8x8x8xf32, #tpu.memory_space<vmem>>, %arg7: memref<2x8x32xf32, #tpu.memory_space<vmem>>) attributes {dimension_semantics = [#tpu.dimension_semantics<parallel>], iteration_bounds = array<i64: 1>, scalar_prefetch = 0 : i64, scratch_operands = 0 : i64, tpu.core_type = #tpu.core_type<tc>, window_params = [{transform_indices = @transform_0, window_bounds = array<i64: 2, 8, 32>}, {pipeline_mode = #tpu.pipeline_mode<synchronous>, transform_indices = @transform_1, window_bounds = array<i64: 32, 96>}, {pipeline_mode = #tpu.pipeline_mode<synchronous>, transform_indices = @transform_2, window_bounds = array<i64: 1, 96>}, {pipeline_mode = #tpu.pipeline_mode<synchronous>, transform_indices = @transform_3, window_bounds = array<i64: 32, 32>}, {pipeline_mode = #tpu.pipeline_mode<synchronous>, transform_indices = @transform_4, window_bounds = array<i64: 1, 32>}, {transform_indices = @transform_5, window_bounds = array<i64: 8, 8, 8>}, {transform_indices = @transform_6, window_bounds = array<i64: 2, 8, 32>}]} {
    %c0 = arith.constant 0 : index
    %c0_0 = arith.constant 0 : index
    %c0_1 = arith.constant 0 : index
    %0 = vector.load %arg1[%c0, %c0_0, %c0_1] : memref<2x8x32xf32, #tpu.memory_space<vmem>>, vector<2x8x32xf32>
    %1 = vector.shape_cast %0 : vector<2x8x32xf32> to vector<16x32xf32>
    %c0_2 = arith.constant 0 : index
    %c0_3 = arith.constant 0 : index
    %2 = vector.load %arg2[%c0_2, %c0_3] : memref<32x96xf32, #tpu.memory_space<vmem>>, vector<32x96xf32>
    %cst = arith.constant dense<0.000000e+00> : vector<16x96xf32>
    %3 = tpu.matmul %1, %2, %cst {dimension_numbers = #tpu.dot_dimension_numbers<[1], [0], [0], [1], [0, 0, 1, 1], [], []>} : vector<16x32xf32>, vector<32x96xf32>, vector<16x96xf32> -> vector<16x96xf32>
    %c0_4 = arith.constant 0 : index
    %c0_5 = arith.constant 0 : index
    %4 = vector.load %arg3[%c0_4, %c0_5] : memref<1x96xf32, #tpu.memory_space<vmem>>, vector<1x96xf32>
    %5 = vector.broadcast %4 : vector<1x96xf32> to vector<16x96xf32>
    %6 = arith.addf %3, %5 : vector<16x96xf32>
    %7 = vector.extract_strided_slice %6 {offsets = [0, 0], sizes = [8, 8], strides = [1, 1]} : vector<16x96xf32> to vector<8x8xf32>
    %cst_6 = arith.constant 0.353553385 : f32
    %8 = vector.broadcast %cst_6 : f32 to vector<8x8xf32>
    %9 = arith.mulf %7, %8 : vector<8x8xf32>
    %10 = vector.extract_strided_slice %6 {offsets = [0, 32], sizes = [8, 8], strides = [1, 1]} : vector<16x96xf32> to vector<8x8xf32>
    %11 = vector.extract_strided_slice %6 {offsets = [0, 64], sizes = [8, 8], strides = [1, 1]} : vector<16x96xf32> to vector<8x8xf32>
    %cst_7 = arith.constant dense<0.000000e+00> : vector<8x8xf32>
    %12 = tpu.matmul %9, %10, %cst_7 {dimension_numbers = #tpu.dot_dimension_numbers<[1], [1], [0], [0], [0, 0, 1, 0], [], []>} : vector<8x8xf32>, vector<8x8xf32>, vector<8x8xf32> -> vector<8x8xf32>
    %cst_8 = arith.constant dense<0xFF800000> : vector<8xf32>
    %13 = vector.multi_reduction <maximumf>, %12, %cst_8 [1] : vector<8x8xf32> to vector<8xf32>
    %14 = vector.shape_cast %13 : vector<8xf32> to vector<8x1xf32>
    %15 = vector.broadcast %14 : vector<8x1xf32> to vector<8x8xf32>
    %16 = arith.subf %12, %15 : vector<8x8xf32>
    %17 = math.exp %16 : vector<8x8xf32>
    %cst_9 = arith.constant dense<0.000000e+00> : vector<8xf32>
    %18 = vector.multi_reduction <add>, %17, %cst_9 [1] : vector<8x8xf32> to vector<8xf32>
    %19 = vector.shape_cast %18 : vector<8xf32> to vector<8x1xf32>
    %20 = tpu.reciprocal %19 : vector<8x1xf32> -> vector<8x1xf32>
    %21 = vector.broadcast %20 : vector<8x1xf32> to vector<8x8xf32>
    %22 = arith.mulf %17, %21 : vector<8x8xf32>
    %c0_10 = arith.constant 0 : index
    %c0_11 = arith.constant 0 : index
    %c0_12 = arith.constant 0 : index
    %23 = vector.load %arg6[%c0_10, %c0_11, %c0_12] : memref<8x8x8xf32, #tpu.memory_space<vmem>>, vector<1x8x8xf32>
    %24 = vector.shape_cast %23 : vector<1x8x8xf32> to vector<8x8xf32>
    %25 = vector.shape_cast %22 : vector<8x8xf32> to vector<1x8x8xf32>
    tpu.vector_store %arg6[%c0_10, %c0_11, %c0_12], %25 {strides = array<i32>} : memref<8x8x8xf32, #tpu.memory_space<vmem>>, vector<1x8x8xf32>,
    %cst_13 = arith.constant dense<0.000000e+00> : vector<8x8xf32>
    %26 = tpu.matmul %22, %11, %cst_13 {dimension_numbers = #tpu.dot_dimension_numbers<[1], [0], [0], [1], [0, 0, 1, 1], [], []>} : vector<8x8xf32>, vector<8x8xf32>, vector<8x8xf32> -> vector<8x8xf32>
    %27 = vector.extract_strided_slice %6 {offsets = [0, 8], sizes = [8, 8], strides = [1, 1]} : vector<16x96xf32> to vector<8x8xf32>
    %cst_14 = arith.constant 0.353553385 : f32
    %28 = vector.broadcast %cst_14 : f32 to vector<8x8xf32>
    %29 = arith.mulf %27, %28 : vector<8x8xf32>
    %30 = vector.extract_strided_slice %6 {offsets = [0, 40], sizes = [8, 8], strides = [1, 1]} : vector<16x96xf32> to vector<8x8xf32>
    %31 = vector.extract_strided_slice %6 {offsets = [0, 72], sizes = [8, 8], strides = [1, 1]} : vector<16x96xf32> to vector<8x8xf32>
    %cst_15 = arith.constant dense<0.000000e+00> : vector<8x8xf32>
    %32 = tpu.matmul %29, %30, %cst_15 {dimension_numbers = #tpu.dot_dimension_numbers<[1], [1], [0], [0], [0, 0, 1, 0], [], []>} : vector<8x8xf32>, vector<8x8xf32>, vector<8x8xf32> -> vector<8x8xf32>
    %cst_16 = arith.constant dense<0xFF800000> : vector<8xf32>
    %33 = vector.multi_reduction <maximumf>, %32, %cst_16 [1] : vector<8x8xf32> to vector<8xf32>
    %34 = vector.shape_cast %33 : vector<8xf32> to vector<8x1xf32>
    %35 = vector.broadcast %34 : vector<8x1xf32> to vector<8x8xf32>
    %36 = arith.subf %32, %35 : vector<8x8xf32>
    %37 = math.exp %36 : vector<8x8xf32>
    %cst_17 = arith.constant dense<0.000000e+00> : vector<8xf32>
    %38 = vector.multi_reduction <add>, %37, %cst_17 [1] : vector<8x8xf32> to vector<8xf32>
    %39 = vector.shape_cast %38 : vector<8xf32> to vector<8x1xf32>
    %40 = tpu.reciprocal %39 : vector<8x1xf32> -> vector<8x1xf32>
    %41 = vector.broadcast %40 : vector<8x1xf32> to vector<8x8xf32>
    %42 = arith.mulf %37, %41 : vector<8x8xf32>
    %c1 = arith.constant 1 : index
    %c0_18 = arith.constant 0 : index
    %c0_19 = arith.constant 0 : index
    %43 = vector.load %arg6[%c1, %c0_18, %c0_19] : memref<8x8x8xf32, #tpu.memory_space<vmem>>, vector<1x8x8xf32>
    %44 = vector.shape_cast %43 : vector<1x8x8xf32> to vector<8x8xf32>
    %45 = vector.shape_cast %42 : vector<8x8xf32> to vector<1x8x8xf32>
    tpu.vector_store %arg6[%c1, %c0_18, %c0_19], %45 {strides = array<i32>} : memref<8x8x8xf32, #tpu.memory_space<vmem>>, vector<1x8x8xf32>,
    %cst_20 = arith.constant dense<0.000000e+00> : vector<8x8xf32>
    %46 = tpu.matmul %42, %31, %cst_20 {dimension_numbers = #tpu.dot_dimension_numbers<[1], [0], [0], [1], [0, 0, 1, 1], [], []>} : vector<8x8xf32>, vector<8x8xf32>, vector<8x8xf32> -> vector<8x8xf32>
    %47 = vector.extract_strided_slice %6 {offsets = [0, 16], sizes = [8, 8], strides = [1, 1]} : vector<16x96xf32> to vector<8x8xf32>
    %cst_21 = arith.constant 0.353553385 : f32
    %48 = vector.broadcast %cst_21 : f32 to vector<8x8xf32>
    %49 = arith.mulf %47, %48 : vector<8x8xf32>
    %50 = vector.extract_strided_slice %6 {offsets = [0, 48], sizes = [8, 8], strides = [1, 1]} : vector<16x96xf32> to vector<8x8xf32>
    %51 = vector.extract_strided_slice %6 {offsets = [0, 80], sizes = [8, 8], strides = [1, 1]} : vector<16x96xf32> to vector<8x8xf32>
    %cst_22 = arith.constant dense<0.000000e+00> : vector<8x8xf32>
    %52 = tpu.matmul %49, %50, %cst_22 {dimension_numbers = #tpu.dot_dimension_numbers<[1], [1], [0], [0], [0, 0, 1, 0], [], []>} : vector<8x8xf32>, vector<8x8xf32>, vector<8x8xf32> -> vector<8x8xf32>
    %cst_23 = arith.constant dense<0xFF800000> : vector<8xf32>
    %53 = vector.multi_reduction <maximumf>, %52, %cst_23 [1] : vector<8x8xf32> to vector<8xf32>
    %54 = vector.shape_cast %53 : vector<8xf32> to vector<8x1xf32>
    %55 = vector.broadcast %54 : vector<8x1xf32> to vector<8x8xf32>
    %56 = arith.subf %52, %55 : vector<8x8xf32>
    %57 = math.exp %56 : vector<8x8xf32>
    %cst_24 = arith.constant dense<0.000000e+00> : vector<8xf32>
    %58 = vector.multi_reduction <add>, %57, %cst_24 [1] : vector<8x8xf32> to vector<8xf32>
    %59 = vector.shape_cast %58 : vector<8xf32> to vector<8x1xf32>
    %60 = tpu.reciprocal %59 : vector<8x1xf32> -> vector<8x1xf32>
    %61 = vector.broadcast %60 : vector<8x1xf32> to vector<8x8xf32>
    %62 = arith.mulf %57, %61 : vector<8x8xf32>
    %c2 = arith.constant 2 : index
    %c0_25 = arith.constant 0 : index
    %c0_26 = arith.constant 0 : index
    %63 = vector.load %arg6[%c2, %c0_25, %c0_26] : memref<8x8x8xf32, #tpu.memory_space<vmem>>, vector<1x8x8xf32>
    %64 = vector.shape_cast %63 : vector<1x8x8xf32> to vector<8x8xf32>
    %65 = vector.shape_cast %62 : vector<8x8xf32> to vector<1x8x8xf32>
    tpu.vector_store %arg6[%c2, %c0_25, %c0_26], %65 {strides = array<i32>} : memref<8x8x8xf32, #tpu.memory_space<vmem>>, vector<1x8x8xf32>,
    %cst_27 = arith.constant dense<0.000000e+00> : vector<8x8xf32>
    %66 = tpu.matmul %62, %51, %cst_27 {dimension_numbers = #tpu.dot_dimension_numbers<[1], [0], [0], [1], [0, 0, 1, 1], [], []>} : vector<8x8xf32>, vector<8x8xf32>, vector<8x8xf32> -> vector<8x8xf32>
    %67 = vector.extract_strided_slice %6 {offsets = [0, 24], sizes = [8, 8], strides = [1, 1]} : vector<16x96xf32> to vector<8x8xf32>
    %cst_28 = arith.constant 0.353553385 : f32
    %68 = vector.broadcast %cst_28 : f32 to vector<8x8xf32>
    %69 = arith.mulf %67, %68 : vector<8x8xf32>
    %70 = vector.extract_strided_slice %6 {offsets = [0, 56], sizes = [8, 8], strides = [1, 1]} : vector<16x96xf32> to vector<8x8xf32>
    %71 = vector.extract_strided_slice %6 {offsets = [0, 88], sizes = [8, 8], strides = [1, 1]} : vector<16x96xf32> to vector<8x8xf32>
    %cst_29 = arith.constant dense<0.000000e+00> : vector<8x8xf32>
    %72 = tpu.matmul %69, %70, %cst_29 {dimension_numbers = #tpu.dot_dimension_numbers<[1], [1], [0], [0], [0, 0, 1, 0], [], []>} : vector<8x8xf32>, vector<8x8xf32>, vector<8x8xf32> -> vector<8x8xf32>
    %cst_30 = arith.constant dense<0xFF800000> : vector<8xf32>
    %73 = vector.multi_reduction <maximumf>, %72, %cst_30 [1] : vector<8x8xf32> to vector<8xf32>
    %74 = vector.shape_cast %73 : vector<8xf32> to vector<8x1xf32>
    %75 = vector.broadcast %74 : vector<8x1xf32> to vector<8x8xf32>
    %76 = arith.subf %72, %75 : vector<8x8xf32>
    %77 = math.exp %76 : vector<8x8xf32>
    %cst_31 = arith.constant dense<0.000000e+00> : vector<8xf32>
    %78 = vector.multi_reduction <add>, %77, %cst_31 [1] : vector<8x8xf32> to vector<8xf32>
    %79 = vector.shape_cast %78 : vector<8xf32> to vector<8x1xf32>
    %80 = tpu.reciprocal %79 : vector<8x1xf32> -> vector<8x1xf32>
    %81 = vector.broadcast %80 : vector<8x1xf32> to vector<8x8xf32>
    %82 = arith.mulf %77, %81 : vector<8x8xf32>
    %c3 = arith.constant 3 : index
    %c0_32 = arith.constant 0 : index
    %c0_33 = arith.constant 0 : index
    %83 = vector.load %arg6[%c3, %c0_32, %c0_33] : memref<8x8x8xf32, #tpu.memory_space<vmem>>, vector<1x8x8xf32>
    %84 = vector.shape_cast %83 : vector<1x8x8xf32> to vector<8x8xf32>
    %85 = vector.shape_cast %82 : vector<8x8xf32> to vector<1x8x8xf32>
    tpu.vector_store %arg6[%c3, %c0_32, %c0_33], %85 {strides = array<i32>} : memref<8x8x8xf32, #tpu.memory_space<vmem>>, vector<1x8x8xf32>,
    %cst_34 = arith.constant dense<0.000000e+00> : vector<8x8xf32>
    %86 = tpu.matmul %82, %71, %cst_34 {dimension_numbers = #tpu.dot_dimension_numbers<[1], [0], [0], [1], [0, 0, 1, 1], [], []>} : vector<8x8xf32>, vector<8x8xf32>, vector<8x8xf32> -> vector<8x8xf32>
    %87 = tpu.concatenate %26, %46, %66, %86 in 1 : vector<8x8xf32>, vector<8x8xf32>, vector<8x8xf32>, vector<8x8xf32> -> vector<8x32xf32>
    %88 = vector.extract_strided_slice %6 {offsets = [8, 0], sizes = [8, 8], strides = [1, 1]} : vector<16x96xf32> to vector<8x8xf32>
    %cst_35 = arith.constant 0.353553385 : f32
    %89 = vector.broadcast %cst_35 : f32 to vector<8x8xf32>
    %90 = arith.mulf %88, %89 : vector<8x8xf32>
    %91 = vector.extract_strided_slice %6 {offsets = [8, 32], sizes = [8, 8], strides = [1, 1]} : vector<16x96xf32> to vector<8x8xf32>
    %92 = vector.extract_strided_slice %6 {offsets = [8, 64], sizes = [8, 8], strides = [1, 1]} : vector<16x96xf32> to vector<8x8xf32>
    %cst_36 = arith.constant dense<0.000000e+00> : vector<8x8xf32>
    %93 = tpu.matmul %90, %91, %cst_36 {dimension_numbers = #tpu.dot_dimension_numbers<[1], [1], [0], [0], [0, 0, 1, 0], [], []>} : vector<8x8xf32>, vector<8x8xf32>, vector<8x8xf32> -> vector<8x8xf32>
    %cst_37 = arith.constant dense<0xFF800000> : vector<8xf32>
    %94 = vector.multi_reduction <maximumf>, %93, %cst_37 [1] : vector<8x8xf32> to vector<8xf32>
    %95 = vector.shape_cast %94 : vector<8xf32> to vector<8x1xf32>
    %96 = vector.broadcast %95 : vector<8x1xf32> to vector<8x8xf32>
    %97 = arith.subf %93, %96 : vector<8x8xf32>
    %98 = math.exp %97 : vector<8x8xf32>
    %cst_38 = arith.constant dense<0.000000e+00> : vector<8xf32>
    %99 = vector.multi_reduction <add>, %98, %cst_38 [1] : vector<8x8xf32> to vector<8xf32>
    %100 = vector.shape_cast %99 : vector<8xf32> to vector<8x1xf32>
    %101 = tpu.reciprocal %100 : vector<8x1xf32> -> vector<8x1xf32>
    %102 = vector.broadcast %101 : vector<8x1xf32> to vector<8x8xf32>
    %103 = arith.mulf %98, %102 : vector<8x8xf32>
    %c4 = arith.constant 4 : index
    %c0_39 = arith.constant 0 : index
    %c0_40 = arith.constant 0 : index
    %104 = vector.load %arg6[%c4, %c0_39, %c0_40] : memref<8x8x8xf32, #tpu.memory_space<vmem>>, vector<1x8x8xf32>
    %105 = vector.shape_cast %104 : vector<1x8x8xf32> to vector<8x8xf32>
    %106 = vector.shape_cast %103 : vector<8x8xf32> to vector<1x8x8xf32>
    tpu.vector_store %arg6[%c4, %c0_39, %c0_40], %106 {strides = array<i32>} : memref<8x8x8xf32, #tpu.memory_space<vmem>>, vector<1x8x8xf32>,
    %cst_41 = arith.constant dense<0.000000e+00> : vector<8x8xf32>
    %107 = tpu.matmul %103, %92, %cst_41 {dimension_numbers = #tpu.dot_dimension_numbers<[1], [0], [0], [1], [0, 0, 1, 1], [], []>} : vector<8x8xf32>, vector<8x8xf32>, vector<8x8xf32> -> vector<8x8xf32>
    %108 = vector.extract_strided_slice %6 {offsets = [8, 8], sizes = [8, 8], strides = [1, 1]} : vector<16x96xf32> to vector<8x8xf32>
    %cst_42 = arith.constant 0.353553385 : f32
    %109 = vector.broadcast %cst_42 : f32 to vector<8x8xf32>
    %110 = arith.mulf %108, %109 : vector<8x8xf32>
    %111 = vector.extract_strided_slice %6 {offsets = [8, 40], sizes = [8, 8], strides = [1, 1]} : vector<16x96xf32> to vector<8x8xf32>
    %112 = vector.extract_strided_slice %6 {offsets = [8, 72], sizes = [8, 8], strides = [1, 1]} : vector<16x96xf32> to vector<8x8xf32>
    %cst_43 = arith.constant dense<0.000000e+00> : vector<8x8xf32>
    %113 = tpu.matmul %110, %111, %cst_43 {dimension_numbers = #tpu.dot_dimension_numbers<[1], [1], [0], [0], [0, 0, 1, 0], [], []>} : vector<8x8xf32>, vector<8x8xf32>, vector<8x8xf32> -> vector<8x8xf32>
    %cst_44 = arith.constant dense<0xFF800000> : vector<8xf32>
    %114 = vector.multi_reduction <maximumf>, %113, %cst_44 [1] : vector<8x8xf32> to vector<8xf32>
    %115 = vector.shape_cast %114 : vector<8xf32> to vector<8x1xf32>
    %116 = vector.broadcast %115 : vector<8x1xf32> to vector<8x8xf32>
    %117 = arith.subf %113, %116 : vector<8x8xf32>
    %118 = math.exp %117 : vector<8x8xf32>
    %cst_45 = arith.constant dense<0.000000e+00> : vector<8xf32>
    %119 = vector.multi_reduction <add>, %118, %cst_45 [1] : vector<8x8xf32> to vector<8xf32>
    %120 = vector.shape_cast %119 : vector<8xf32> to vector<8x1xf32>
    %121 = tpu.reciprocal %120 : vector<8x1xf32> -> vector<8x1xf32>
    %122 = vector.broadcast %121 : vector<8x1xf32> to vector<8x8xf32>
    %123 = arith.mulf %118, %122 : vector<8x8xf32>
    %c5 = arith.constant 5 : index
    %c0_46 = arith.constant 0 : index
    %c0_47 = arith.constant 0 : index
    %124 = vector.load %arg6[%c5, %c0_46, %c0_47] : memref<8x8x8xf32, #tpu.memory_space<vmem>>, vector<1x8x8xf32>
    %125 = vector.shape_cast %124 : vector<1x8x8xf32> to vector<8x8xf32>
    %126 = vector.shape_cast %123 : vector<8x8xf32> to vector<1x8x8xf32>
    tpu.vector_store %arg6[%c5, %c0_46, %c0_47], %126 {strides = array<i32>} : memref<8x8x8xf32, #tpu.memory_space<vmem>>, vector<1x8x8xf32>,
    %cst_48 = arith.constant dense<0.000000e+00> : vector<8x8xf32>
    %127 = tpu.matmul %123, %112, %cst_48 {dimension_numbers = #tpu.dot_dimension_numbers<[1], [0], [0], [1], [0, 0, 1, 1], [], []>} : vector<8x8xf32>, vector<8x8xf32>, vector<8x8xf32> -> vector<8x8xf32>
    %128 = vector.extract_strided_slice %6 {offsets = [8, 16], sizes = [8, 8], strides = [1, 1]} : vector<16x96xf32> to vector<8x8xf32>
    %cst_49 = arith.constant 0.353553385 : f32
    %129 = vector.broadcast %cst_49 : f32 to vector<8x8xf32>
    %130 = arith.mulf %128, %129 : vector<8x8xf32>
    %131 = vector.extract_strided_slice %6 {offsets = [8, 48], sizes = [8, 8], strides = [1, 1]} : vector<16x96xf32> to vector<8x8xf32>
    %132 = vector.extract_strided_slice %6 {offsets = [8, 80], sizes = [8, 8], strides = [1, 1]} : vector<16x96xf32> to vector<8x8xf32>
    %cst_50 = arith.constant dense<0.000000e+00> : vector<8x8xf32>
    %133 = tpu.matmul %130, %131, %cst_50 {dimension_numbers = #tpu.dot_dimension_numbers<[1], [1], [0], [0], [0, 0, 1, 0], [], []>} : vector<8x8xf32>, vector<8x8xf32>, vector<8x8xf32> -> vector<8x8xf32>
    %cst_51 = arith.constant dense<0xFF800000> : vector<8xf32>
    %134 = vector.multi_reduction <maximumf>, %133, %cst_51 [1] : vector<8x8xf32> to vector<8xf32>
    %135 = vector.shape_cast %134 : vector<8xf32> to vector<8x1xf32>
    %136 = vector.broadcast %135 : vector<8x1xf32> to vector<8x8xf32>
    %137 = arith.subf %133, %136 : vector<8x8xf32>
    %138 = math.exp %137 : vector<8x8xf32>
    %cst_52 = arith.constant dense<0.000000e+00> : vector<8xf32>
    %139 = vector.multi_reduction <add>, %138, %cst_52 [1] : vector<8x8xf32> to vector<8xf32>
    %140 = vector.shape_cast %139 : vector<8xf32> to vector<8x1xf32>
    %141 = tpu.reciprocal %140 : vector<8x1xf32> -> vector<8x1xf32>
    %142 = vector.broadcast %141 : vector<8x1xf32> to vector<8x8xf32>
    %143 = arith.mulf %138, %142 : vector<8x8xf32>
    %c6 = arith.constant 6 : index
    %c0_53 = arith.constant 0 : index
    %c0_54 = arith.constant 0 : index
    %144 = vector.load %arg6[%c6, %c0_53, %c0_54] : memref<8x8x8xf32, #tpu.memory_space<vmem>>, vector<1x8x8xf32>
    %145 = vector.shape_cast %144 : vector<1x8x8xf32> to vector<8x8xf32>
    %146 = vector.shape_cast %143 : vector<8x8xf32> to vector<1x8x8xf32>
    tpu.vector_store %arg6[%c6, %c0_53, %c0_54], %146 {strides = array<i32>} : memref<8x8x8xf32, #tpu.memory_space<vmem>>, vector<1x8x8xf32>,
    %cst_55 = arith.constant dense<0.000000e+00> : vector<8x8xf32>
    %147 = tpu.matmul %143, %132, %cst_55 {dimension_numbers = #tpu.dot_dimension_numbers<[1], [0], [0], [1], [0, 0, 1, 1], [], []>} : vector<8x8xf32>, vector<8x8xf32>, vector<8x8xf32> -> vector<8x8xf32>
    %148 = vector.extract_strided_slice %6 {offsets = [8, 24], sizes = [8, 8], strides = [1, 1]} : vector<16x96xf32> to vector<8x8xf32>
    %cst_56 = arith.constant 0.353553385 : f32
    %149 = vector.broadcast %cst_56 : f32 to vector<8x8xf32>
    %150 = arith.mulf %148, %149 : vector<8x8xf32>
    %151 = vector.extract_strided_slice %6 {offsets = [8, 56], sizes = [8, 8], strides = [1, 1]} : vector<16x96xf32> to vector<8x8xf32>
    %152 = vector.extract_strided_slice %6 {offsets = [8, 88], sizes = [8, 8], strides = [1, 1]} : vector<16x96xf32> to vector<8x8xf32>
    %cst_57 = arith.constant dense<0.000000e+00> : vector<8x8xf32>
    %153 = tpu.matmul %150, %151, %cst_57 {dimension_numbers = #tpu.dot_dimension_numbers<[1], [1], [0], [0], [0, 0, 1, 0], [], []>} : vector<8x8xf32>, vector<8x8xf32>, vector<8x8xf32> -> vector<8x8xf32>
    %cst_58 = arith.constant dense<0xFF800000> : vector<8xf32>
    %154 = vector.multi_reduction <maximumf>, %153, %cst_58 [1] : vector<8x8xf32> to vector<8xf32>
    %155 = vector.shape_cast %154 : vector<8xf32> to vector<8x1xf32>
    %156 = vector.broadcast %155 : vector<8x1xf32> to vector<8x8xf32>
    %157 = arith.subf %153, %156 : vector<8x8xf32>
    %158 = math.exp %157 : vector<8x8xf32>
    %cst_59 = arith.constant dense<0.000000e+00> : vector<8xf32>
    %159 = vector.multi_reduction <add>, %158, %cst_59 [1] : vector<8x8xf32> to vector<8xf32>
    %160 = vector.shape_cast %159 : vector<8xf32> to vector<8x1xf32>
    %161 = tpu.reciprocal %160 : vector<8x1xf32> -> vector<8x1xf32>
    %162 = vector.broadcast %161 : vector<8x1xf32> to vector<8x8xf32>
    %163 = arith.mulf %158, %162 : vector<8x8xf32>
    %c7 = arith.constant 7 : index
    %c0_60 = arith.constant 0 : index
    %c0_61 = arith.constant 0 : index
    %164 = vector.load %arg6[%c7, %c0_60, %c0_61] : memref<8x8x8xf32, #tpu.memory_space<vmem>>, vector<1x8x8xf32>
    %165 = vector.shape_cast %164 : vector<1x8x8xf32> to vector<8x8xf32>
    %166 = vector.shape_cast %163 : vector<8x8xf32> to vector<1x8x8xf32>
    tpu.vector_store %arg6[%c7, %c0_60, %c0_61], %166 {strides = array<i32>} : memref<8x8x8xf32, #tpu.memory_space<vmem>>, vector<1x8x8xf32>,
    %cst_62 = arith.constant dense<0.000000e+00> : vector<8x8xf32>
    %167 = tpu.matmul %163, %152, %cst_62 {dimension_numbers = #tpu.dot_dimension_numbers<[1], [0], [0], [1], [0, 0, 1, 1], [], []>} : vector<8x8xf32>, vector<8x8xf32>, vector<8x8xf32> -> vector<8x8xf32>
    %168 = tpu.concatenate %107, %127, %147, %167 in 1 : vector<8x8xf32>, vector<8x8xf32>, vector<8x8xf32>, vector<8x8xf32> -> vector<8x32xf32>
    %169 = tpu.concatenate %87, %168 in 0 : vector<8x32xf32>, vector<8x32xf32> -> vector<16x32xf32>
    %c0_63 = arith.constant 0 : index
    %c0_64 = arith.constant 0 : index
    %170 = vector.load %arg4[%c0_63, %c0_64] : memref<32x32xf32, #tpu.memory_space<vmem>>, vector<32x32xf32>
    %cst_65 = arith.constant dense<0.000000e+00> : vector<16x32xf32>
    %171 = tpu.matmul %169, %170, %cst_65 {dimension_numbers = #tpu.dot_dimension_numbers<[1], [0], [0], [1], [0, 0, 1, 1], [], []>} : vector<16x32xf32>, vector<32x32xf32>, vector<16x32xf32> -> vector<16x32xf32>
    %c0_66 = arith.constant 0 : index
    %c0_67 = arith.constant 0 : index
    %172 = vector.load %arg5[%c0_66, %c0_67] : memref<1x32xf32, #tpu.memory_space<vmem>>, vector<1x32xf32>
    %173 = vector.broadcast %172 : vector<1x32xf32> to vector<16x32xf32>
    %174 = arith.addf %171, %173 : vector<16x32xf32>
    %175 = vector.shape_cast %174 : vector<16x32xf32> to vector<2x8x32xf32>
    %c0_68 = arith.constant 0 : index
    %c0_69 = arith.constant 0 : index
    %c0_70 = arith.constant 0 : index
    %176 = vector.load %arg7[%c0_68, %c0_69, %c0_70] : memref<2x8x32xf32, #tpu.memory_space<vmem>>, vector<2x8x32xf32>
    tpu.vector_store %arg7[%c0_68, %c0_69, %c0_70], %175 {strides = array<i32>} : memref<2x8x32xf32, #tpu.memory_space<vmem>>, vector<2x8x32xf32>,
    return
  }
  func.func @transform_0(%arg0: i32) -> (i32, i32, i32) {
    %c0_i32 = arith.constant 0 : i32
    %c0_i32_0 = arith.constant 0 : i32
    %c0_i32_1 = arith.constant 0 : i32
    return %arg0, %c0_i32, %c0_i32_0 : i32, i32, i32
  }
  func.func @transform_1(%arg0: i32) -> (i32, i32) {
    %c0_i32 = arith.constant 0 : i32
    %c0_i32_0 = arith.constant 0 : i32
    %c0_i32_1 = arith.constant 0 : i32
    return %c0_i32, %c0_i32_0 : i32, i32
  }
  func.func @transform_2(%arg0: i32) -> (i32, i32) {
    %c0_i32 = arith.constant 0 : i32
    %c0_i32_0 = arith.constant 0 : i32
    %c0_i32_1 = arith.constant 0 : i32
    return %c0_i32, %c0_i32_0 : i32, i32
  }
  func.func @transform_3(%arg0: i32) -> (i32, i32) {
    %c0_i32 = arith.constant 0 : i32
    %c0_i32_0 = arith.constant 0 : i32
    %c0_i32_1 = arith.constant 0 : i32
    return %c0_i32, %c0_i32_0 : i32, i32
  }
  func.func @transform_4(%arg0: i32) -> (i32, i32) {
    %c0_i32 = arith.constant 0 : i32
    %c0_i32_0 = arith.constant 0 : i32
    %c0_i32_1 = arith.constant 0 : i32
    return %c0_i32, %c0_i32_0 : i32, i32
  }
  func.func @transform_5(%arg0: i32) -> (i32, i32, i32) {
    %c0_i32 = arith.constant 0 : i32
    %c0_i32_0 = arith.constant 0 : i32
    %c0_i32_1 = arith.constant 0 : i32
    return %arg0, %c0_i32, %c0_i32_0 : i32, i32, i32
  }
  func.func @transform_6(%arg0: i32) -> (i32, i32, i32) {
    %c0_i32 = arith.constant 0 : i32
    %c0_i32_0 = arith.constant 0 : i32
    %c0_i32_1 = arith.constant 0 : i32
    return %arg0, %c0_i32, %c0_i32_0 : i32, i32, i32
  }
}

</mosaic_0001>

<bundles_post_ra>
// kernel: tpu_custom_call.1
= control target key start
LH: loop header
LB: loop body
LE: loop exit
PB: predicated region body
PF: predicated region fallthrough
CT: control target
= control target key end

     0   :  { %12 = vsyncpa [#allocation3], 0  ;;  %s2316_s0 = inlined_call_operand.hbm [shape: f32[2,8,32], index: 0, kind: input, shape index: {}]   ;;  %s2317_s1 = inlined_call_operand.hbm [shape: f32[32,96], index: 1, kind: input, shape index: {}]   ;;  %s2318_s2 = inlined_call_operand.vmem [shape: f32[1,96], index: 2, kind: input, shape index: {}]   ;;  %s2319_s3 = inlined_call_operand.hbm [shape: f32[32,32], index: 3, kind: input, shape index: {}]   ;;  %s2320_s4 = inlined_call_operand.vmem [shape: f32[1,32], index: 4, kind: input, shape index: {}]   ;;  %s2321_s5 = inlined_call_operand.hbm [shape: f32[8,8,8], index: 5, kind: output, shape index: {0}]   ;;  %s2322_s6 = inlined_call_operand.hbm [shape: f32[2,8,32], index: 6, kind: output, shape index: {1}]  }
   0x1   :  { %13 = vsyncpa [#allocation6], 0 }
   0x2   :  { %14 = vsyncpa [#allocation4], 0 }
   0x3   :  { %15 = vsyncpa [#allocation10], 0  ;;  %s2022_s21 = smov [#allocation5]   ;;  %s2023_s23 = smov [#allocation2]  }
   0x4   :  { %s33_s22 = sshll.u32 %s2022_s21, 4  ;;  %s21_s24 = sshll.u32 %s2023_s23, 4  ;;  %s34_s22 = int_to_ptr.vmem [resolvable:$true] %s33_s22  ;;  %s2079_s24 = int_to_ptr.vmem [resolvable:$true] %s21_s24 }
   0x5   :  { %s1904_s27 = scalar_lea.hbm %s2317_s1, 512 }
   0x6   :  { %p1905_p0 = scmp.ne.s32.totalorder %s2317_s1, %s1904_s27  ;;  %p1908_p1 = scmp.lt.u32.totalorder %s1904_s27, %s2317_s1 }
   0x8   :  { %p1910_p2 = pnand %p1908_p1, %p1905_p0 }
   0xa   :  { %1913 = shalt.err (!%p1910_p2)
}
   0xb   :  { %s1914_s8 = scalar_lea.vmem %s34_s22, 512  ;;  %p1919_p4 = scmp.lt.s32.totalorder %s34_s22, %s34_s22 }
   0xc   :  { %p1915_p3 = scmp.ne.s32.totalorder %s34_s22, %s1914_s8  ;;  %p1920_p5 = scmp.lt.s32.totalorder %s1914_s8, %s1914_s8 }
   0xe   :  { %p1921_p6 = por %p1920_p5, %p1919_p4 }
  0x10   :  { %p1922_p7 = pnand %p1921_p6, %p1915_p3 }
  0x12   :  { %1925 = shalt.err (!%p1922_p7)
}
  0x13   :  { %s2024_s9 = smov 128   ;;  %s2025_s10 = smov 8  }
  0x14   :  { %39 = dma.hbm_to_vmem [thread:$0]  %s2317_s1, 512, %s34_s22, [#allocation6], %s2024_s9, %s2024_s9, %s2025_s10  }
  0x15   :  { %s1926_s15 = scalar_lea.hbm %s2316_s0, 256 }
  0x16   :  { %p1927_p8 = scmp.ne.s32.totalorder %s2316_s0, %s1926_s15  ;;  %p1930_p9 = scmp.lt.u32.totalorder %s1926_s15, %s2316_s0 }
  0x18   :  { %p1932_p10 = pnand %p1930_p9, %p1927_p8 }
  0x1a   :  { %1935 = shalt.err (!%p1932_p10)
}
  0x1b   :  { %s1936_s20 = scalar_lea.vmem %s2079_s24, 256  ;;  %p1941_p12 = scmp.lt.s32.totalorder %s2079_s24, %s2079_s24 }
  0x1c   :  { %p1937_p11 = scmp.ne.s32.totalorder %s2079_s24, %s1936_s20  ;;  %p1942_p13 = scmp.lt.s32.totalorder %s1936_s20, %s1936_s20 }
  0x1e   :  { %p1943_p0 = por %p1942_p13, %p1941_p12 }
  0x20   :  { %p1944_p1 = pnand %p1943_p0, %p1937_p11 }
  0x22   :  { %1947 = shalt.err (!%p1944_p1)
}
  0x23   :  { %27 = dma.hbm_to_vmem [thread:$0]  %s2316_s0, 256, %s2079_s24, [#allocation3], %s2024_s9, %s2024_s9, %s2025_s10  }
  0x24   :  { %s2026_s22 = smov [#allocation7]   ;;  %s1948_s27 = scalar_lea.hbm %s2319_s3, 512 }
  0x25   :  { %s47_s23 = sshll.u32 %s2026_s22, 4  ;;  %p1949_p2 = scmp.ne.s32.totalorder %s2319_s3, %s1948_s27  ;;  %s48_s23 = int_to_ptr.vmem [resolvable:$true] %s47_s23 }
  0x26   :  { %p1952_p3 = scmp.lt.u32.totalorder %s1948_s27, %s2319_s3 }
  0x28   :  { %p1954_p4 = pnand %p1952_p3, %p1949_p2 }
  0x2a   :  { %1957 = shalt.err (!%p1954_p4)
}
  0x2b   :  { %s1958_s8 = scalar_lea.vmem %s48_s23, 512  ;;  %p1963_p6 = scmp.lt.s32.totalorder %s48_s23, %s48_s23 }
  0x2c   :  { %p1959_p5 = scmp.ne.s32.totalorder %s48_s23, %s1958_s8  ;;  %p1964_p7 = scmp.lt.s32.totalorder %s1958_s8, %s1958_s8 }
  0x2e   :  { %p1965_p8 = por %p1964_p7, %p1963_p6 }
  0x30   :  { %p1966_p9 = pnand %p1965_p8, %p1959_p5 }
  0x32   :  { %1969 = shalt.err (!%p1966_p9)
}
  0x33   :  { %53 = dma.hbm_to_vmem [thread:$0]  %s2319_s3, 512, %s48_s23, [#allocation6], %s2024_s9, %s2024_s9, %s2025_s10  }
  0x34   :  { %2014 = dma.done.wait [#allocation3], 256  }
  0x35   :  { %2015 = vsyncadd [#allocation3], 4294967040 }
  0x36   :  { %2016 = dma.done.wait [#allocation6], 1024  }
  0x37   :  { %2017 = vsyncadd [#allocation6], 4294966272  ;;  %vm78_vm0 = vcmask 261120   ;;  %v67_v0 = vld [vmem:[#allocation5] sm:$0xff]  ;;  %v68_v1 = vld [vmem:[#allocation5 + $0x8] sm:$0xff]  ;;  %v2027_v8 = vmov 0.0  }
  0x38   :  { %v69_v2 = vld [vmem:[#allocation5 + $0x10] sm:$0xff]  ;;  %v1834_v3 = vpack.c.bf16 %v68_v1, %v67_v0  ;;  %v70_v4 = vld [vmem:[#allocation5 + $0x18] sm:$0xff]  ;;  %1743 = vmatprep.subr.mxu1 %v2027_v8  ;;  %vm2028_vm1 = vmmov 0   ;;  %s2029_s12 = smov 64   ;;  %s2030_s13 = smov 96   ;;  %vm164_vm2 = vcmask 64512  }
  0x39   :  { %v65_v5 = vld [vmem:[#allocation2] sm:$0xff]  ;;  %v1838_v6 = vpack.c.bf16 %v70_v4, %v69_v2  ;;  %v66_v7 = vld [vmem:[#allocation2 + $0x8] sm:$0xff]  ;;  %1745 = vmatprep.mubr.msk.f32.mxu1 %vm2028_vm1, %v2027_v8  ;;  %s2031_s14 = smov 88   ;;  %s2033_s15 = smov 80   ;;  %vm842_vm3 = vcmask 130048   ;;  %vm844_vm4 = vcmask 195584  }
  0x3a   :  { %1740 = vmatprep.mubr.msk.f32.mxu0 %vm78_vm0, %v65_v5  ;;  %1835 = vmatprep.subr.bf16.mxu0 %v1834_v3  ;;  %v1658_v9 = vld [vmem:[%s2318_s2] ss:$0 sm:$0xff]  ;;  %s2032_s2 = smov 120   ;;  %s2034_s16 = smov 112  }
  0x3b   :  { %1837 = vmatpush3.bf16.msra.mxu0 %v1834_v3  ;;  %s2035_s17 = smov 104   ;;  %s2036_s18 = smov 72  }
  0x3c   :  { %1839 = vmatprep.subr.bf16.mxu0 %v1838_v6  ;;  %s2037_s19 = smov 48   ;;  %s2038_s20 = smov 56  }
  0x3d   :  { %s2039_s1 = smov 40   ;;  %s2040_s21 = smov 16  }
  0x3e   :  { %s2041_s22 = smov 24   ;;  %s2042_s23 = smov [#allocation8]  }
  0x3f   :  { %1841 = vmatpush3.bf16.msra.mxu0 %v1838_v6  ;;  %s1629_s25 = sshll.u32 %s2042_s23, 4  ;;  %s1630_s25 = int_to_ptr.vmem [resolvable:$true] %s1629_s25 }
  0x40   :  { %1763 = vmatprep.subr.mxu0 %v2027_v8  ;;  %s1970_s26 = scalar_lea.vmem %s1630_s25, 1024  ;;  %p1975_p11 = scmp.lt.s32.totalorder %s1630_s25, %s1630_s25 }
  0x41   :  { %p1971_p10 = scmp.ne.s32.totalorder %s1630_s25, %s1970_s26  ;;  %p1976_p12 = scmp.lt.s32.totalorder %s1970_s26, %s1970_s26 }
  0x42   :  { %1741 = vmatmul.mubr.msk.f32.vlgmr.msra.gmra.mrb[0].mxu0 %vm78_vm0, %v66_v7 }
  0x43   :  { %1765 = vmatprep.mubr.msk.f32.mxu0 %vm2028_vm1, %v2027_v8  ;;  %p1977_p13 = por %p1976_p12, %p1975_p11 }
  0x45   :  { %p1978_p0 = pnand %p1977_p13, %p1971_p10 }
 0x115   :  { %v1742_v10 = vpop.f32.mrb[0].mxu0 }
 0x116   :  { %v2142_v11 = vadd.f32 %v1742_v10, %v1658_v9  ;;  %v151_v12 = vpop.f32.mrb[1].mxu0 }
 0x117   :  { %v2144_v13 = vadd.f32 %v1658_v9, %v151_v12 }
 0x118   :  { %v846_v26 = vmul.f32 0.35355338, %v2142_v11 }
 0x119   :  { %252 = vrot.lane.b32.xlu1 %v2144_v13, %s2029_s12  ;;  %162 = vrot.lane.b32.xlu0 %v2144_v13, %s2030_s13  ;;  %v160_v14 = vmul.f32 0.35355338, %v2144_v13 }
 0x11d   :  { %330 = vrot.lane.b32.xlu1 %v2144_v13, %s2031_s14 }
 0x121   :  { %328 = vrot.lane.b32.xlu1 %v160_v14, %s2032_s2 }
 0x125   :  { %497 = vrot.lane.b32.xlu1 %v2144_v13, %s2033_s15 }
 0x129   :  { %495 = vrot.lane.b32.xlu1 %v160_v14, %s2034_s16 }
 0x12d   :  { %662 = vrot.lane.b32.xlu1 %v160_v14, %s2035_s17 }
 0x18b   :  { %v253_v15 = vpop.permute.xlu1 %252  ;;  %v163_v16 = vpop.permute.xlu0 %162 }
 0x18c   :  { %1744 = vmatpush3.xpose.msk.msra.mxu1 %vm164_vm2, %v163_v16 }
 0x18d   :  { %1748 = vmatprep.subr.mxu1 %v2027_v8 }
 0x18f   :  { %v331_v17 = vpop.permute.xlu1 %330  ;;  %1746 = vmatmul.mubr.msk.f32.vlgmr.msra.gmra.mrb[0].mxu1 %vm164_vm2, %v160_v14 }
 0x190   :  { %1749 = vmatpush3.msra.mxu1 %v253_v15  ;;  %1750 = vmatprep.mubr.msk.f32.mxu1 %vm2028_vm1, %v2027_v8 }
 0x191   :  { %1753 = vmatprep.subr.mxu1 %v2027_v8 }
 0x193   :  { %v329_v18 = vpop.permute.xlu1 %328 }
 0x197   :  { %v498_v19 = vpop.permute.xlu1 %497 }
 0x198   :  { %1764 = vmatpush3.xpose.msk.msra.mxu0 %vm164_vm2, %v498_v19 }
 0x199   :  { %1773 = vmatprep.subr.mxu0 %v2027_v8 }
 0x19b   :  { %v496_v20 = vpop.permute.xlu1 %495 }
 0x19c   :  { %1766 = vmatmul.mubr.msk.f32.vlgmr.msra.gmra.mrb[2].mxu0 %vm164_vm2, %v496_v20 }
 0x19d   :  { %1775 = vmatprep.mubr.msk.f32.mxu0 %vm2028_vm1, %v2027_v8 }
 0x19f   :  { %v663_v32 = vpop.permute.xlu1 %662 }
 0x262   :  { %v236_v21 = vpop.f32.mrb[0].mxu1 }
 0x263   :  { %v1747_v22 = vpop.f32.mrb[1].mxu1  ;;  %v240_v23 = vsel %vm164_vm2, %v236_v21, -inf }
 0x264   :  { %241 = vmax.xlane.f32.xlu0 %v240_v23 }
 0x26f   :  { %v2168_v24 = vpop.f32.mrb[2].mxu0 }
 0x270   :  { %v1767_v25 = vpop.f32.mrb[3].mxu0  ;;  %v573_v27 = vsel %vm164_vm2, %v2168_v24, -inf }
 0x27a   :  { %664 = vrot.lane.b32.xlu0 %v2144_v13, %s2036_s18 }
 0x27e   :  { %1181 = vrot.lane.b32.xlu0 %v846_v26, %s2034_s16 }
 0x282   :  { %1348 = vrot.lane.b32.xlu0 %v846_v26, %s2035_s17 }
 0x2a1   :  { %574 = vmax.xlane.f32.xlu0 %v573_v27 }
 0x2f1   :  { %v242_v28 = vpop.xlane.xlu0 %241 }
 0x2f2   :  { %v243_v29 = vsub.f32 %v236_v21, %v242_v28 }
 0x2f4   :  { %v244_v30 = vmul.f32 1.442695, %v243_v29 }
 0x2f5   :  { %v665_v31 = vpop.permute.xlu0 %664 }
 0x2f6   :  { %1872 = vpow2.f32 %v244_v30  ;;  %1774 = vmatpush3.xpose.msk.msra.mxu0 %vm164_vm2, %v665_v31 }
 0x2f7   :  { %1783 = vmatprep.subr.mxu0 %v2027_v8 }
 0x2f9   :  { %1776 = vmatmul.mubr.msk.f32.vlgmr.msra.gmra.mrb[4].mxu0 %vm164_vm2, %v663_v32  ;;  %v1182_v42 = vpop.permute.xlu0 %1181 }
 0x2fa   :  { %1785 = vmatprep.mubr.msk.f32.mxu0 %vm2028_vm1, %v2027_v8 }
 0x2fd   :  { %v1349_v44 = vpop.permute.xlu0 %1348 }
 0x300   :  { %v1873_v33 = vpop.eup %1872 }
 0x301   :  { %v246_v34 = vsel %vm164_vm2, %v1873_v33, 0.0 }
 0x302   :  { %247 = vadd.xlane.f32.xlu1 %v246_v34 }
 0x313   :  { %848 = vrot.lane.b32.xlu1 %v2142_v11, %s2030_s13 }
 0x317   :  { %1016 = vrot.lane.b32.xlu1 %v2142_v11, %s2031_s14 }
 0x31b   :  { %1014 = vrot.lane.b32.xlu1 %v846_v26, %s2032_s2 }
 0x31f   :  { %1183 = vrot.lane.b32.xlu1 %v2142_v11, %s2033_s15 }
 0x323   :  { %1350 = vrot.lane.b32.xlu1 %v2142_v11, %s2036_s18 }
 0x32e   :  { %v575_v48 = vpop.xlane.xlu0 %574 }
 0x32f   :  { %v576_v50 = vsub.f32 %v2168_v24, %v575_v48 }
 0x331   :  { %v577_v54 = vmul.f32 1.442695, %v576_v50 }
 0x38f   :  { %v248_v35 = vpop.xlane.xlu1 %247 }
 0x390   :  { %1874 = vrcp.f32 %v248_v35 }
 0x391   :  { %1876 = vpow2.f32 %v577_v54 }
 0x393   :  { %v849_v36 = vpop.permute.xlu1 %848 }
 0x394   :  { %1784 = vmatpush3.xpose.msk.msra.mxu0 %vm164_vm2, %v849_v36 }
 0x395   :  { %1793 = vmatprep.subr.mxu0 %v2027_v8 }
 0x397   :  { %v1017_v37 = vpop.permute.xlu1 %1016  ;;  %1786 = vmatmul.mubr.msk.f32.vlgmr.msra.gmra.mrb[6].mxu0 %vm164_vm2, %v846_v26 }
 0x398   :  { %1794 = vmatpush3.xpose.msk.msra.mxu0 %vm164_vm2, %v1017_v37  ;;  %1795 = vmatprep.mubr.msk.f32.mxu0 %vm2028_vm1, %v2027_v8 }
 0x399   :  { %1803 = vmatprep.subr.mxu0 %v2027_v8 }
 0x39a   :  { %v1875_v38 = vpop.eup %1874 }
 0x39b   :  { %v250_v39 = vmul.f32 %v1875_v38, %v1873_v33  ;;  %v1015_v40 = vpop.permute.xlu1 %1014  ;;  %v1877_v6 = vpop.eup %1876 }
 0x39c   :  { %1796 = vmatmul.mubr.msk.f32.vlgmr.msra.gmra.mrb[8].mxu0 %vm164_vm2, %v1015_v40  ;;  %v579_v10 = vsel %vm164_vm2, %v1877_v6, 0.0 }
 0x39d   :  { %251 = vst.msk [vmem:[#allocation8] sm:$0xff] %vm164_vm2, %v250_v39  ;;  %1751 = vmatmul.mubr.msk.f32.vlgmr.msra.gmra.mrb[2].mxu1 %vm164_vm2, %v250_v39  ;;  %1805 = vmatprep.mubr.msk.f32.mxu0 %vm2028_vm1, %v2027_v8 }
 0x39e   :  { %1754 = vmatpush3.xpose.msk.msra.mxu1 %vm164_vm2, %v331_v17  ;;  %1755 = vmatprep.mubr.msk.f32.mxu1 %vm2028_vm1, %v2027_v8 }
 0x39f   :  { %v1184_v41 = vpop.permute.xlu1 %1183  ;;  %1758 = vmatprep.subr.mxu1 %v2027_v8 }
 0x3a0   :  { %1804 = vmatpush3.xpose.msk.msra.mxu0 %vm164_vm2, %v1184_v41 }
 0x3a1   :  { %1756 = vmatmul.mubr.msk.f32.vlgmr.msra.gmra.mrb[4].mxu1 %vm164_vm2, %v329_v18  ;;  %1813 = vmatprep.subr.mxu0 %v2027_v8 }
 0x3a2   :  { %1760 = vmatprep.mubr.msk.f32.mxu1 %vm2028_vm1, %v2027_v8 }
 0x3a3   :  { %v1351_v43 = vpop.permute.xlu1 %1350  ;;  %1806 = vmatmul.mubr.msk.f32.vlgmr.msra.gmra.mrb[10].mxu0 %vm164_vm2, %v1182_v42 }
 0x3a4   :  { %1814 = vmatpush3.xpose.msk.msra.mxu0 %vm164_vm2, %v1351_v43  ;;  %1815 = vmatprep.mubr.msk.f32.mxu0 %vm2028_vm1, %v2027_v8 }
 0x3a7   :  { %1816 = vmatmul.mubr.msk.f32.vlgmr.msra.gmra.mrb[12].mxu0 %vm164_vm2, %v1349_v44 }
 0x3cc   :  { %v736_v45 = vpop.f32.mrb[4].mxu0 }
 0x3cd   :  { %v1777_v46 = vpop.f32.mrb[5].mxu0  ;;  %v740_v47 = vsel %vm164_vm2, %v736_v45, -inf }
 0x3ce   :  { %741 = vmax.xlane.f32.xlu0 %v740_v47 }
 0x45b   :  { %v742_v49 = vpop.xlane.xlu0 %741 }
 0x45c   :  { %v743_v53 = vsub.f32 %v736_v45, %v742_v49 }
 0x45e   :  { %v744_v56 = vmul.f32 1.442695, %v743_v53 }
 0x460   :  { %1878 = vpow2.f32 %v744_v56 }
 0x46a   :  { %v921_v51 = vpop.f32.mrb[6].mxu0  ;;  %v1879_v9 = vpop.eup %1878 }
 0x46b   :  { %v1787_v52 = vpop.f32.mrb[7].mxu0  ;;  %v925_v2 = vsel %vm164_vm2, %v921_v51, -inf  ;;  %v746_v12 = vsel %vm164_vm2, %v1879_v9, 0.0 }
 0x46f   :  { %v1088_v55 = vpop.f32.mrb[8].mxu0 }
 0x470   :  { %v2216_v57 = vpop.f32.mrb[2].mxu1  ;;  %v1797_v58 = vpop.f32.mrb[9].mxu0  ;;  %v1092_v59 = vsel %vm164_vm2, %v1088_v55, -inf }
 0x471   :  { %1093 = vmax.xlane.f32.xlu0 %v1092_v59  ;;  %v1752_v60 = vpop.f32.mrb[3].mxu1 }
 0x474   :  { %v2219_v61 = vpop.f32.mrb[4].mxu1 }
 0x475   :  { %v1757_v62 = vpop.f32.mrb[5].mxu1  ;;  %v406_v63 = vsel %vm164_vm2, %v2219_v61, -inf }
 0x476   :  { %v1255_v0 = vpop.f32.mrb[10].mxu0  ;;  %407 = vmax.xlane.f32.xlu1 %v406_v63 }
 0x477   :  { %v1807_v1 = vpop.f32.mrb[11].mxu0  ;;  %v1259_v7 = vsel %vm164_vm2, %v1255_v0, -inf }
 0x47a   :  { %v1422_v3 = vpop.f32.mrb[12].mxu0  ;;  %926 = vmax.xlane.f32.xlu1 %v925_v2 }
 0x47b   :  { %v1817_v4 = vpop.f32.mrb[13].mxu0  ;;  %v1426_v5 = vsel %vm164_vm2, %v1422_v3, -inf }
 0x47c   :  { %1427 = vmax.xlane.f32.xlu0 %v1426_v5  ;;  %v1530_v4 = vld [vmem:[#allocation7] sm:$0xff]  ;;  %v1531_v5 = vld [vmem:[#allocation7 + $0x8] sm:$0xff] }
 0x47e   :  { %1260 = vmax.xlane.f32.xlu1 %v1259_v7  ;;  %v1842_v7 = vpack.c.bf16 %v1531_v5, %v1530_v4 }
 0x480   :  { %580 = vadd.xlane.f32.xlu0 %v579_v10  ;;  %1843 = vmatprep.subr.bf16.mxu0 %v1842_v7  ;;  %v1532_v10 = vld [vmem:[#allocation7 + $0x10] sm:$0xff] }
 0x481   :  { %1845 = vmatpush3.bf16.msra.mxu0 %v1842_v7 }
 0x482   :  { %747 = vadd.xlane.f32.xlu1 %v746_v12  ;;  %v1533_v12 = vld [vmem:[#allocation7 + $0x18] sm:$0xff] }
 0x4fe   :  { %v1094_v14 = vpop.xlane.xlu0 %1093 }
 0x4ff   :  { %v1095_v15 = vsub.f32 %v1088_v55, %v1094_v14 }
 0x501   :  { %v1096_v16 = vmul.f32 1.442695, %v1095_v15  ;;  %v1846_v15 = vpack.c.bf16 %v1533_v12, %v1532_v10 }
 0x503   :  { %1880 = vpow2.f32 %v1096_v16  ;;  %v408_v17 = vpop.xlane.xlu1 %407  ;;  %1847 = vmatprep.subr.bf16.mxu0 %v1846_v15 }
 0x504   :  { %v409_v41 = vsub.f32 %v2219_v61, %v408_v17  ;;  %1849 = vmatpush3.bf16.msra.mxu0 %v1846_v15 }
 0x506   :  { %v410_v42 = vmul.f32 1.442695, %v409_v41 }
 0x507   :  { %v927_v18 = vpop.xlane.xlu1 %926 }
 0x508   :  { %v928_v19 = vsub.f32 %v921_v51, %v927_v18 }
 0x509   :  { %v1428_v20 = vpop.xlane.xlu0 %1427 }
 0x50a   :  { %v929_v21 = vmul.f32 1.442695, %v928_v19  ;;  %v1429_v22 = vsub.f32 %v1422_v3, %v1428_v20 }
 0x50b   :  { %v1261_v23 = vpop.xlane.xlu1 %1260 }
 0x50c   :  { %1882 = vpow2.f32 %v929_v21  ;;  %v1430_v24 = vmul.f32 1.442695, %v1429_v22  ;;  %v1262_v25 = vsub.f32 %v1255_v0, %v1261_v23 }
 0x50d   :  { %v1881_v26 = vpop.eup %1880  ;;  %v581_v27 = vpop.xlane.xlu0 %580 }
 0x50e   :  { %1884 = vpow2.f32 %v1430_v24  ;;  %v1263_v28 = vmul.f32 1.442695, %v1262_v25  ;;  %v1098_v29 = vsel %vm164_vm2, %v1881_v26, 0.0 }
 0x50f   :  { %1886 = vrcp.f32 %v581_v27  ;;  %1099 = vadd.xlane.f32.xlu1 %v1098_v29  ;;  %v748_v30 = vpop.xlane.xlu1 %747 }
 0x510   :  { %1888 = vpow2.f32 %v1263_v28 }
 0x511   :  { %1890 = vrcp.f32 %v748_v30 }
 0x512   :  { %1892 = vpow2.f32 %v410_v42 }
 0x516   :  { %v1883_v31 = vpop.eup %1882 }
 0x517   :  { %v931_v32 = vsel %vm164_vm2, %v1883_v31, 0.0 }
 0x518   :  { %v1885_v33 = vpop.eup %1884  ;;  %932 = vadd.xlane.f32.xlu0 %v931_v32 }
 0x519   :  { %v1887_v34 = vpop.eup %1886  ;;  %v1432_v35 = vsel %vm164_vm2, %v1885_v33, 0.0 }
 0x51a   :  { %v1889_v36 = vpop.eup %1888  ;;  %v583_v37 = vmul.f32 %v1887_v34, %v1877_v6  ;;  %1433 = vadd.xlane.f32.xlu1 %v1432_v35 }
 0x51b   :  { %v1891_v38 = vpop.eup %1890  ;;  %v1265_v39 = vsel %vm164_vm2, %v1889_v36, 0.0 }
 0x51c   :  { %585 = vst.msk [vmem:[#allocation8 + $0x10] sm:$0xff] %vm164_vm2, %v583_v37  ;;  %v750_v40 = vmul.f32 %v1891_v38, %v1879_v9  ;;  %1266 = vadd.xlane.f32.xlu0 %v1265_v39  ;;  %v1893_v43 = vpop.eup %1892 }
 0x51d   :  { %v412_v44 = vsel %vm164_vm2, %v1893_v43, 0.0 }
 0x51e   :  { %752 = vst.msk [vmem:[#allocation8 + $0x18] sm:$0xff] %vm164_vm2, %v750_v40 }
 0x52b   :  { %586 = vrot.lane.b32.xlu1 %v2144_v13, %s2037_s19 }
 0x532   :  { %419 = vrot.lane.b32.xlu0 %v2144_v13, %s2038_s20 }
 0x536   :  { %938 = vrot.lane.b32.xlu0 %v2142_v11, %s2029_s12 }
 0x53a   :  { %1272 = vrot.lane.b32.xlu0 %v2142_v11, %s2037_s19 }
 0x54f   :  { %413 = vadd.xlane.f32.xlu1 %v412_v44 }
 0x560   :  { %753 = vrot.lane.b32.xlu1 %v2144_v13, %s2039_s1 }
 0x564   :  { %1105 = vrot.lane.b32.xlu1 %v2142_v11, %s2038_s20 }
 0x568   :  { %1439 = vrot.lane.b32.xlu1 %v2142_v11, %s2039_s1 }
 0x59c   :  { %v1100_v45 = vpop.xlane.xlu1 %1099 }
 0x59d   :  { %1894 = vrcp.f32 %v1100_v45 }
 0x5a5   :  { %v933_v46 = vpop.xlane.xlu0 %932 }
 0x5a6   :  { %1896 = vrcp.f32 %v933_v46 }
 0x5a7   :  { %v1895_v47 = vpop.eup %1894  ;;  %v1434_v48 = vpop.xlane.xlu1 %1433 }
 0x5a8   :  { %v1102_v49 = vmul.f32 %v1895_v47, %v1881_v26  ;;  %1898 = vrcp.f32 %v1434_v48 }
 0x5a9   :  { %v1267_v50 = vpop.xlane.xlu0 %1266 }
 0x5aa   :  { %1104 = vst.msk [vmem:[#allocation8 + $0x28] sm:$0xff] %vm164_vm2, %v1102_v49  ;;  %1900 = vrcp.f32 %v1267_v50 }
 0x5ab   :  { %v587_v56 = vpop.permute.xlu1 %586 }
 0x5ad   :  { %v420_v51 = vpop.permute.xlu0 %419 }
 0x5ae   :  { %1759 = vmatpush3.msra.mxu1 %v420_v51 }
 0x5af   :  { %1768 = vmatprep.subr.mxu1 %v2027_v8 }
 0x5b0   :  { %v1897_v13 = vpop.eup %1896 }
 0x5b1   :  { %v935_v52 = vmul.f32 %v1897_v13, %v1883_v31  ;;  %v939_v62 = vpop.permute.xlu0 %938 }
 0x5b2   :  { %v1899_v53 = vpop.eup %1898 }
 0x5b3   :  { %937 = vst.msk [vmem:[#allocation8 + $0x20] sm:$0xff] %vm164_vm2, %v935_v52  ;;  %v1436_v11 = vmul.f32 %v1899_v53, %v1885_v33 }
 0x5b4   :  { %v1901_v54 = vpop.eup %1900 }
 0x5b5   :  { %1438 = vst.msk [vmem:[#allocation8 + $0x38] sm:$0xff] %vm164_vm2, %v1436_v11  ;;  %v1269_v55 = vmul.f32 %v1901_v54, %v1889_v36  ;;  %v1273_v0 = vpop.permute.xlu0 %1272 }
 0x5b7   :  { %1271 = vst.msk [vmem:[#allocation8 + $0x30] sm:$0xff] %vm164_vm2, %v1269_v55 }
 0x5dc   :  { %v414_v58 = vpop.xlane.xlu1 %413 }
 0x5dd   :  { %1902 = vrcp.f32 %v414_v58 }
 0x5e0   :  { %v754_v61 = vpop.permute.xlu1 %753 }
 0x5e4   :  { %v1106_v63 = vpop.permute.xlu1 %1105 }
 0x5e7   :  { %v1903_v59 = vpop.eup %1902 }
 0x5e8   :  { %v416_v60 = vmul.f32 %v1903_v59, %v1893_v43  ;;  %v1440_v1 = vpop.permute.xlu1 %1439 }
 0x5ea   :  { %418 = vst.msk [vmem:[#allocation8 + $0x8] sm:$0xff] %vm164_vm2, %v416_v60  ;;  %1761 = vmatmul.mubr.msk.f32.vlgmr.msra.gmra.mrb[6].mxu1 %vm164_vm2, %v416_v60 }
 0x5eb   :  { %1769 = vmatpush3.msra.mxu1 %v587_v56  ;;  %1770 = vmatprep.mubr.msk.f32.mxu1 %vm2028_vm1, %v2027_v8 }
 0x5ec   :  { %1778 = vmatprep.subr.mxu1 %v2027_v8 }
 0x5ee   :  { %1771 = vmatmul.mubr.msk.f32.vlgmr.msra.gmra.mrb[8].mxu1 %vm164_vm2, %v583_v37 }
 0x5ef   :  { %1779 = vmatpush3.msra.mxu1 %v754_v61  ;;  %1780 = vmatprep.mubr.msk.f32.mxu1 %vm2028_vm1, %v2027_v8 }
 0x5f0   :  { %1788 = vmatprep.subr.mxu1 %v2027_v8 }
 0x5f2   :  { %1781 = vmatmul.mubr.msk.f32.vlgmr.msra.gmra.mrb[10].mxu1 %vm164_vm2, %v750_v40 }
 0x5f3   :  { %1789 = vmatpush3.msra.mxu1 %v939_v62  ;;  %1790 = vmatprep.mubr.msk.f32.mxu1 %vm2028_vm1, %v2027_v8 }
 0x5f4   :  { %1798 = vmatprep.subr.mxu1 %v2027_v8 }
 0x5f6   :  { %1791 = vmatmul.mubr.msk.f32.vlgmr.msra.gmra.mrb[12].mxu1 %vm164_vm2, %v935_v52 }
 0x5f7   :  { %1799 = vmatpush3.msra.mxu1 %v1106_v63  ;;  %1800 = vmatprep.mubr.msk.f32.mxu1 %vm2028_vm1, %v2027_v8 }
 0x5f8   :  { %1808 = vmatprep.subr.mxu1 %v2027_v8 }
 0x5fa   :  { %1801 = vmatmul.mubr.msk.f32.vlgmr.msra.gmra.mrb[14].mxu1 %vm164_vm2, %v1102_v49 }
 0x5fb   :  { %1809 = vmatpush3.msra.mxu1 %v1273_v0  ;;  %1810 = vmatprep.mubr.msk.f32.mxu1 %vm2028_vm1, %v2027_v8 }
 0x5fc   :  { %1818 = vmatprep.subr.mxu1 %v2027_v8 }
 0x5fe   :  { %1811 = vmatmul.mubr.msk.f32.vlgmr.msra.gmra.mrb[16].mxu1 %vm164_vm2, %v1269_v55 }
 0x5ff   :  { %1819 = vmatpush3.msra.mxu1 %v1440_v1  ;;  %1820 = vmatprep.mubr.msk.f32.mxu1 %vm2028_vm1, %v2027_v8 }
 0x602   :  { %1821 = vmatmul.mubr.msk.f32.vlgmr.msra.gmra.mrb[18].mxu1 %vm164_vm2, %v1436_v11 }
 0x6bd   :  { %v491_v2 = vpop.f32.mrb[6].mxu1 }
 0x6be   :  { %830 = vrot.lane.b32.xlu0 %v491_v2, %s2025_s10  ;;  %v1762_v3 = vpop.f32.mrb[7].mxu1 }
 0x6c1   :  { %v658_v6 = vpop.f32.mrb[8].mxu1 }
 0x6c2   :  { %834 = vrot.lane.b32.xlu1 %v658_v6, %s2040_s21  ;;  %v1772_v9 = vpop.f32.mrb[9].mxu1 }
 0x6c5   :  { %v825_v14 = vpop.f32.mrb[10].mxu1 }
 0x6c6   :  { %838 = vrot.lane.b32.xlu1 %v825_v14, %s2041_s22  ;;  %v1782_v8 = vpop.f32.mrb[11].mxu1 }
 0x6c9   :  { %v1010_v16 = vpop.f32.mrb[12].mxu1 }
 0x6ca   :  { %v1792_v17 = vpop.f32.mrb[13].mxu1 }
 0x6cd   :  { %v1177_v18 = vpop.f32.mrb[14].mxu1 }
 0x6ce   :  { %1516 = vrot.lane.b32.xlu0 %v1177_v18, %s2025_s10  ;;  %v1802_v19 = vpop.f32.mrb[15].mxu1 }
 0x6d1   :  { %v1344_v20 = vpop.f32.mrb[16].mxu1 }
 0x6d2   :  { %1520 = vrot.lane.b32.xlu0 %v1344_v20, %s2040_s21  ;;  %v1812_v21 = vpop.f32.mrb[17].mxu1 }
 0x6d5   :  { %v1511_v22 = vpop.f32.mrb[18].mxu1 }
 0x6d6   :  { %1524 = vrot.lane.b32.xlu1 %v1511_v22, %s2041_s22  ;;  %v1822_v23 = vpop.f32.mrb[19].mxu1 }
 0x730   :  { %v831_v24 = vpop.permute.xlu0 %830 }
 0x731   :  { %v841_v26 = vsel %vm164_vm2, %v2216_v57, %v831_v24 }
 0x734   :  { %v835_v25 = vpop.permute.xlu1 %834 }
 0x735   :  { %v843_v27 = vsel %vm842_vm3, %v841_v26, %v835_v25 }
 0x738   :  { %v839_v28 = vpop.permute.xlu1 %838 }
 0x739   :  { %v845_v29 = vsel %vm844_vm4, %v843_v27, %v839_v28 }
 0x73a   :  { %1831 = vmatprep.mubr.msk.f32.mxu0 %vm78_vm0, %v845_v29 }
 0x740   :  { %v1517_v30 = vpop.permute.xlu0 %1516 }
 0x741   :  { %v1527_v32 = vsel %vm164_vm2, %v1010_v16, %v1517_v30 }
 0x744   :  { %v1521_v31 = vpop.permute.xlu0 %1520 }
 0x745   :  { %v1528_v33 = vsel %vm842_vm3, %v1527_v32, %v1521_v31 }
 0x748   :  { %v1525_v34 = vpop.permute.xlu1 %1524 }
 0x749   :  { %v1529_v35 = vsel %vm844_vm4, %v1528_v33, %v1525_v34 }
 0x74a   :  { %1832 = vmatmul.mubr.msk.f32.vlgmr.msra.gmra.mrb[14].mxu0 %vm78_vm0, %v1529_v35 }
 0x74b   :  { %1981 = shalt.err (!%p1978_p0)
}
 0x74c   :  { %s1982_s29 = scalar_lea.hbm %s2321_s5, 1024 }
 0x74d   :  { %p1983_p1 = scmp.ne.s32.totalorder %s2321_s5, %s1982_s29  ;;  %p1986_p2 = scmp.lt.u32.totalorder %s1982_s29, %s2321_s5 }
 0x74f   :  { %p1988_p3 = pnand %p1986_p2, %p1983_p1 }
 0x751   :  { %1991 = shalt.err (!%p1988_p3)
}
 0x752   :  { %1635 = dma.vmem_to_hbm [thread:$0]  %s1630_s25, 1024, %s2321_s5, [#allocation4], %s2024_s9, %s2024_s9, %s2025_s10  }
 0x753   :  { %v1685_v57 = vld [vmem:[%s2320_s4] ss:$0 sm:$0xff]  ;;  %s2043_s13 = smov [#allocation9]  }
 0x754   :  { %s1641_s14 = sshll.u32 %s2043_s13, 4  ;;  %s1642_s14 = int_to_ptr.vmem [resolvable:$true] %s1641_s14 }
 0x755   :  { %s1992_s2 = scalar_lea.vmem %s1642_s14, 256  ;;  %p1997_p5 = scmp.lt.s32.totalorder %s1642_s14, %s1642_s14 }
 0x756   :  { %p1993_p4 = scmp.ne.s32.totalorder %s1642_s14, %s1992_s2  ;;  %p1998_p6 = scmp.lt.s32.totalorder %s1992_s2, %s1992_s2 }
 0x758   :  { %p1999_p7 = por %p1998_p6, %p1997_p5 }
 0x75a   :  { %p2000_p8 = pnand %p1999_p7, %p1993_p4 }
 0x81d   :  { %v1833_v36 = vpop.f32.mrb[14].mxu0 }
 0x81e   :  { %v1619_v37 = vadd.f32 %v1833_v36, %v1685_v57  ;;  %v1613_v38 = vpop.f32.mrb[15].mxu0 }
 0x81f   :  { %v1614_v39 = vadd.f32 %v1685_v57, %v1613_v38 }
 0x820   :  { %1623 = vst.msk [vmem:[#allocation9 + $0x8] sm:$0xff] %vm78_vm0, %v1619_v37 }
 0x821   :  { %1622 = vst.msk [vmem:[#allocation9] sm:$0xff] %vm78_vm0, %v1614_v39 }
 0x822   :  { %2003 = shalt.err (!%p2000_p8)
}
 0x823   :  { %s2004_s15 = scalar_lea.hbm %s2322_s6, 256 }
 0x824   :  { %p2005_p9 = scmp.ne.s32.totalorder %s2322_s6, %s2004_s15  ;;  %p2008_p10 = scmp.lt.u32.totalorder %s2004_s15, %s2322_s6 }
 0x826   :  { %p2010_p11 = pnand %p2008_p10, %p2005_p9 }
 0x828   :  { %2013 = shalt.err (!%p2010_p11)
}
 0x829   :  { %1647 = dma.vmem_to_hbm [thread:$0]  %s1642_s14, 256, %s2322_s6, [#allocation10], %s2024_s9, %s2024_s9, %s2025_s10  }
 0x82a   :  { %2018 = dma.done.wait [#allocation4], 1024  }
 0x82b   :  { %2019 = vsyncadd [#allocation4], 4294966272 }
 0x82c   :  { %2020 = dma.done.wait [#allocation10], 256  }
 0x82d   :  { %2021 = vsyncadd [#allocation10], 4294967040 }
 0x82e   :  { %1654 = vsyncpa [#allocation3], 1 }
 0x82f   :  { %1655 = vsyncpa [#allocation6], 1 }
 0x830   :  { %1656 = vsyncpa [#allocation4], 1 }
 0x831   :  { %1657 = vsyncpa [#allocation10], 1 }

// kernel: tpu_custom_call.1
= control target key start
LH: loop header
LB: loop body
LE: loop exit
PB: predicated region body
PF: predicated region fallthrough
CT: control target
= control target key end

     0   :  { %12 = vsyncpa [#allocation3], 0  ;;  %s2316_s0 = inlined_call_operand.hbm [shape: f32[2,8,32], index: 0, kind: input, shape index: {}]   ;;  %s2317_s1 = inlined_call_operand.hbm [shape: f32[32,96], index: 1, kind: input, shape index: {}]   ;;  %s2318_s2 = inlined_call_operand.vmem [shape: f32[1,96], index: 2, kind: input, shape index: {}]   ;;  %s2319_s3 = inlined_call_operand.hbm [shape: f32[32,32], index: 3, kind: input, shape index: {}]   ;;  %s2320_s4 = inlined_call_operand.vmem [shape: f32[1,32], index: 4, kind: input, shape index: {}]   ;;  %s2321_s5 = inlined_call_operand.hbm [shape: f32[8,8,8], index: 5, kind: output, shape index: {0}]   ;;  %s2322_s6 = inlined_call_operand.hbm [shape: f32[2,8,32], index: 6, kind: output, shape index: {1}]  }
   0x1   :  { %13 = vsyncpa [#allocation6], 0 }
   0x2   :  { %14 = vsyncpa [#allocation4], 0 }
   0x3   :  { %15 = vsyncpa [#allocation10], 0  ;;  %s2022_s21 = smov [#allocation5]   ;;  %s2023_s23 = smov [#allocation2]  }
   0x4   :  { %s33_s22 = sshll.u32 %s2022_s21, 4  ;;  %s21_s24 = sshll.u32 %s2023_s23, 4  ;;  %s34_s22 = int_to_ptr.vmem [resolvable:$true] %s33_s22  ;;  %s2079_s24 = int_to_ptr.vmem [resolvable:$true] %s21_s24 }
   0x5   :  { %s1904_s27 = scalar_lea.hbm %s2317_s1, 512 }
   0x6   :  { %p1905_p0 = scmp.ne.s32.totalorder %s2317_s1, %s1904_s27  ;;  %p1908_p1 = scmp.lt.u32.totalorder %s1904_s27, %s2317_s1 }
   0x8   :  { %p1910_p2 = pnand %p1908_p1, %p1905_p0 }
   0xa   :  { %1913 = shalt.err (!%p1910_p2)
}
   0xb   :  { %s1914_s8 = scalar_lea.vmem %s34_s22, 512  ;;  %p1919_p4 = scmp.lt.s32.totalorder %s34_s22, %s34_s22 }
   0xc   :  { %p1915_p3 = scmp.ne.s32.totalorder %s34_s22, %s1914_s8  ;;  %p1920_p5 = scmp.lt.s32.totalorder %s1914_s8, %s1914_s8 }
   0xe   :  { %p1921_p6 = por %p1920_p5, %p1919_p4 }
  0x10   :  { %p1922_p7 = pnand %p1921_p6, %p1915_p3 }
  0x12   :  { %1925 = shalt.err (!%p1922_p7)
}
  0x13   :  { %s2024_s9 = smov 128   ;;  %s2025_s10 = smov 8  }
  0x14   :  { %39 = dma.hbm_to_vmem [thread:$0]  %s2317_s1, 512, %s34_s22, [#allocation6], %s2024_s9, %s2024_s9, %s2025_s10  }
  0x15   :  { %s1926_s15 = scalar_lea.hbm %s2316_s0, 256 }
  0x16   :  { %p1927_p8 = scmp.ne.s32.totalorder %s2316_s0, %s1926_s15  ;;  %p1930_p9 = scmp.lt.u32.totalorder %s1926_s15, %s2316_s0 }
  0x18   :  { %p1932_p10 = pnand %p1930_p9, %p1927_p8 }
  0x1a   :  { %1935 = shalt.err (!%p1932_p10)
}
  0x1b   :  { %s1936_s20 = scalar_lea.vmem %s2079_s24, 256  ;;  %p1941_p12 = scmp.lt.s32.totalorder %s2079_s24, %s2079_s24 }
  0x1c   :  { %p1937_p11 = scmp.ne.s32.totalorder %s2079_s24, %s1936_s20  ;;  %p1942_p13 = scmp.lt.s32.totalorder %s1936_s20, %s1936_s20 }
  0x1e   :  { %p1943_p0 = por %p1942_p13, %p1941_p12 }
  0x20   :  { %p1944_p1 = pnand %p1943_p0, %p1937_p11 }
  0x22   :  { %1947 = shalt.err (!%p1944_p1)
}
  0x23   :  { %27 = dma.hbm_to_vmem [thread:$0]  %s2316_s0, 256, %s2079_s24, [#allocation3], %s2024_s9, %s2024_s9, %s2025_s10  }
  0x24   :  { %s2026_s22 = smov [#allocation7]   ;;  %s1948_s27 = scalar_lea.hbm %s2319_s3, 512 }
  0x25   :  { %s47_s23 = sshll.u32 %s2026_s22, 4  ;;  %p1949_p2 = scmp.ne.s32.totalorder %s2319_s3, %s1948_s27  ;;  %s48_s23 = int_to_ptr.vmem [resolvable:$true] %s47_s23 }
  0x26   :  { %p1952_p3 = scmp.lt.u32.totalorder %s1948_s27, %s2319_s3 }
  0x28   :  { %p1954_p4 = pnand %p1952_p3, %p1949_p2 }
  0x2a   :  { %1957 = shalt.err (!%p1954_p4)
}
  0x2b   :  { %s1958_s8 = scalar_lea.vmem %s48_s23, 512  ;;  %p1963_p6 = scmp.lt.s32.totalorder %s48_s23, %s48_s23 }
  0x2c   :  { %p1959_p5 = scmp.ne.s32.totalorder %s48_s23, %s1958_s8  ;;  %p1964_p7 = scmp.lt.s32.totalorder %s1958_s8, %s1958_s8 }
  0x2e   :  { %p1965_p8 = por %p1964_p7, %p1963_p6 }
  0x30   :  { %p1966_p9 = pnand %p1965_p8, %p1959_p5 }
  0x32   :  { %1969 = shalt.err (!%p1966_p9)
}
  0x33   :  { %53 = dma.hbm_to_vmem [thread:$0]  %s2319_s3, 512, %s48_s23, [#allocation6], %s2024_s9, %s2024_s9, %s2025_s10  }
  0x34   :  { %2014 = dma.done.wait [#allocation3], 256  }
  0x35   :  { %2015 = vsyncadd [#allocation3], 4294967040 }
  0x36   :  { %2016 = dma.done.wait [#allocation6], 1024  }
  0x37   :  { %2017 = vsyncadd [#allocation6], 4294966272  ;;  %vm78_vm0 = vcmask 261120   ;;  %v67_v0 = vld [vmem:[#allocation5] sm:$0xff]  ;;  %v68_v1 = vld [vmem:[#allocation5 + $0x8] sm:$0xff]  ;;  %v2027_v8 = vmov 0.0  }
  0x38   :  { %v69_v2 = vld [vmem:[#allocation5 + $0x10] sm:$0xff]  ;;  %v1834_v3 = vpack.c.bf16 %v68_v1, %v67_v0  ;;  %v70_v4 = vld [vmem:[#allocation5 + $0x18] sm:$0xff]  ;;  %1743 = vmatprep.subr.mxu1 %v2027_v8  ;;  %vm2028_vm1 = vmmov 0   ;;  %s2029_s12 = smov 64   ;;  %s2030_s13 = smov 96   ;;  %vm164_vm2 = vcmask 64512  }
  0x39   :  { %v65_v5 = vld [vmem:[#allocation2] sm:$0xff]  ;;  %v1838_v6 = vpack.c.bf16 %v70_v4, %v69_v2  ;;  %v66_v7 = vld [vmem:[#allocation2 + $0x8] sm:$0xff]  ;;  %1745 = vmatprep.mubr.msk.f32.mxu1 %vm2028_vm1, %v2027_v8  ;;  %s2031_s14 = smov 88   ;;  %s2033_s15 = smov 80   ;;  %vm842_vm3 = vcmask 130048   ;;  %vm844_vm4 = vcmask 195584  }
  0x3a   :  { %1740 = vmatprep.mubr.msk.f32.mxu0 %vm78_vm0, %v65_v5  ;;  %1835 = vmatprep.subr.bf16.mxu0 %v1834_v3  ;;  %v1658_v9 = vld [vmem:[%s2318_s2] ss:$0 sm:$0xff]  ;;  %s2032_s2 = smov 120   ;;  %s2034_s16 = smov 112  }
  0x3b   :  { %1837 = vmatpush3.bf16.msra.mxu0 %v1834_v3  ;;  %s2035_s17 = smov 104   ;;  %s2036_s18 = smov 72  }
  0x3c   :  { %1839 = vmatprep.subr.bf16.mxu0 %v1838_v6  ;;  %s2037_s19 = smov 48   ;;  %s2038_s20 = smov 56  }
  0x3d   :  { %s2039_s1 = smov 40   ;;  %s2040_s21 = smov 16  }
  0x3e   :  { %s2041_s22 = smov 24   ;;  %s2042_s23 = smov [#allocation8]  }
  0x3f   :  { %1841 = vmatpush3.bf16.msra.mxu0 %v1838_v6  ;;  %s1629_s25 = sshll.u32 %s2042_s23, 4  ;;  %s1630_s25 = int_to_ptr.vmem [resolvable:$true] %s1629_s25 }
  0x40   :  { %1763 = vmatprep.subr.mxu0 %v2027_v8  ;;  %s1970_s26 = scalar_lea.vmem %s1630_s25, 1024  ;;  %p1975_p11 = scmp.lt.s32.totalorder %s1630_s25, %s1630_s25 }
  0x41   :  { %p1971_p10 = scmp.ne.s32.totalorder %s1630_s25, %s1970_s26  ;;  %p1976_p12 = scmp.lt.s32.totalorder %s1970_s26, %s1970_s26 }
  0x42   :  { %1741 = vmatmul.mubr.msk.f32.vlgmr.msra.gmra.mrb[0].mxu0 %vm78_vm0, %v66_v7 }
  0x43   :  { %1765 = vmatprep.mubr.msk.f32.mxu0 %vm2028_vm1, %v2027_v8  ;;  %p1977_p13 = por %p1976_p12, %p1975_p11 }
  0x45   :  { %p1978_p0 = pnand %p1977_p13, %p1971_p10 }
 0x115   :  { %v1742_v10 = vpop.f32.mrb[0].mxu0 }
 0x116   :  { %v2142_v11 = vadd.f32 %v1742_v10, %v1658_v9  ;;  %v151_v12 = vpop.f32.mrb[1].mxu0 }
 0x117   :  { %v2144_v13 = vadd.f32 %v1658_v9, %v151_v12 }
 0x118   :  { %v846_v26 = vmul.f32 0.35355338, %v2142_v11 }
 0x119   :  { %252 = vrot.lane.b32.xlu1 %v2144_v13, %s2029_s12  ;;  %162 = vrot.lane.b32.xlu0 %v2144_v13, %s2030_s13  ;;  %v160_v14 = vmul.f32 0.35355338, %v2144_v13 }
 0x11d   :  { %330 = vrot.lane.b32.xlu1 %v2144_v13, %s2031_s14 }
 0x121   :  { %328 = vrot.lane.b32.xlu1 %v160_v14, %s2032_s2 }
 0x125   :  { %497 = vrot.lane.b32.xlu1 %v2144_v13, %s2033_s15 }
 0x129   :  { %495 = vrot.lane.b32.xlu1 %v160_v14, %s2034_s16 }
 0x12d   :  { %662 = vrot.lane.b32.xlu1 %v160_v14, %s2035_s17 }
 0x18b   :  { %v253_v15 = vpop.permute.xlu1 %252  ;;  %v163_v16 = vpop.permute.xlu0 %162 }
 0x18c   :  { %1744 = vmatpush3.xpose.msk.msra.mxu1 %vm164_vm2, %v163_v16 }
 0x18d   :  { %1748 = vmatprep.subr.mxu1 %v2027_v8 }
 0x18f   :  { %v331_v17 = vpop.permute.xlu1 %330  ;;  %1746 = vmatmul.mubr.msk.f32.vlgmr.msra.gmra.mrb[0].mxu1 %vm164_vm2, %v160_v14 }
 0x190   :  { %1749 = vmatpush3.msra.mxu1 %v253_v15  ;;  %1750 = vmatprep.mubr.msk.f32.mxu1 %vm2028_vm1, %v2027_v8 }
 0x191   :  { %1753 = vmatprep.subr.mxu1 %v2027_v8 }
 0x193   :  { %v329_v18 = vpop.permute.xlu1 %328 }
 0x197   :  { %v498_v19 = vpop.permute.xlu1 %497 }
 0x198   :  { %1764 = vmatpush3.xpose.msk.msra.mxu0 %vm164_vm2, %v498_v19 }
 0x199   :  { %1773 = vmatprep.subr.mxu0 %v2027_v8 }
 0x19b   :  { %v496_v20 = vpop.permute.xlu1 %495 }
 0x19c   :  { %1766 = vmatmul.mubr.msk.f32.vlgmr.msra.gmra.mrb[2].mxu0 %vm164_vm2, %v496_v20 }
 0x19d   :  { %1775 = vmatprep.mubr.msk.f32.mxu0 %vm2028_vm1, %v2027_v8 }
 0x19f   :  { %v663_v32 = vpop.permute.xlu1 %662 }
 0x262   :  { %v236_v21 = vpop.f32.mrb[0].mxu1 }
 0x263   :  { %v1747_v22 = vpop.f32.mrb[1].mxu1  ;;  %v240_v23 = vsel %vm164_vm2, %v236_v21, -inf }
 0x264   :  { %241 = vmax.xlane.f32.xlu0 %v240_v23 }
 0x26f   :  { %v2168_v24 = vpop.f32.mrb[2].mxu0 }
 0x270   :  { %v1767_v25 = vpop.f32.mrb[3].mxu0  ;;  %v573_v27 = vsel %vm164_vm2, %v2168_v24, -inf }
 0x27a   :  { %664 = vrot.lane.b32.xlu0 %v2144_v13, %s2036_s18 }
 0x27e   :  { %1181 = vrot.lane.b32.xlu0 %v846_v26, %s2034_s16 }
 0x282   :  { %1348 = vrot.lane.b32.xlu0 %v846_v26, %s2035_s17 }
 0x2a1   :  { %574 = vmax.xlane.f32.xlu0 %v573_v27 }
 0x2f1   :  { %v242_v28 = vpop.xlane.xlu0 %241 }
 0x2f2   :  { %v243_v29 = vsub.f32 %v236_v21, %v242_v28 }
 0x2f4   :  { %v244_v30 = vmul.f32 1.442695, %v243_v29 }
 0x2f5   :  { %v665_v31 = vpop.permute.xlu0 %664 }
 0x2f6   :  { %1872 = vpow2.f32 %v244_v30  ;;  %1774 = vmatpush3.xpose.msk.msra.mxu0 %vm164_vm2, %v665_v31 }
 0x2f7   :  { %1783 = vmatprep.subr.mxu0 %v2027_v8 }
 0x2f9   :  { %1776 = vmatmul.mubr.msk.f32.vlgmr.msra.gmra.mrb[4].mxu0 %vm164_vm2, %v663_v32  ;;  %v1182_v42 = vpop.permute.xlu0 %1181 }
 0x2fa   :  { %1785 = vmatprep.mubr.msk.f32.mxu0 %vm2028_vm1, %v2027_v8 }
 0x2fd   :  { %v1349_v44 = vpop.permute.xlu0 %1348 }
 0x300   :  { %v1873_v33 = vpop.eup %1872 }
 0x301   :  { %v246_v34 = vsel %vm164_vm2, %v1873_v33, 0.0 }
 0x302   :  { %247 = vadd.xlane.f32.xlu1 %v246_v34 }
 0x313   :  { %848 = vrot.lane.b32.xlu1 %v2142_v11, %s2030_s13 }
 0x317   :  { %1016 = vrot.lane.b32.xlu1 %v2142_v11, %s2031_s14 }
 0x31b   :  { %1014 = vrot.lane.b32.xlu1 %v846_v26, %s2032_s2 }
 0x31f   :  { %1183 = vrot.lane.b32.xlu1 %v2142_v11, %s2033_s15 }
 0x323   :  { %1350 = vrot.lane.b32.xlu1 %v2142_v11, %s2036_s18 }
 0x32e   :  { %v575_v48 = vpop.xlane.xlu0 %574 }
 0x32f   :  { %v576_v50 = vsub.f32 %v2168_v24, %v575_v48 }
 0x331   :  { %v577_v54 = vmul.f32 1.442695, %v576_v50 }
 0x38f   :  { %v248_v35 = vpop.xlane.xlu1 %247 }
 0x390   :  { %1874 = vrcp.f32 %v248_v35 }
 0x391   :  { %1876 = vpow2.f32 %v577_v54 }
 0x393   :  { %v849_v36 = vpop.permute.xlu1 %848 }
 0x394   :  { %1784 = vmatpush3.xpose.msk.msra.mxu0 %vm164_vm2, %v849_v36 }
 0x395   :  { %1793 = vmatprep.subr.mxu0 %v2027_v8 }
 0x397   :  { %v1017_v37 = vpop.permute.xlu1 %1016  ;;  %1786 = vmatmul.mubr.msk.f32.vlgmr.msra.gmra.mrb[6].mxu0 %vm164_vm2, %v846_v26 }
 0x398   :  { %1794 = vmatpush3.xpose.msk.msra.mxu0 %vm164_vm2, %v1017_v37  ;;  %1795 = vmatprep.mubr.msk.f32.mxu0 %vm2028_vm1, %v2027_v8 }
 0x399   :  { %1803 = vmatprep.subr.mxu0 %v2027_v8 }
 0x39a   :  { %v1875_v38 = vpop.eup %1874 }
 0x39b   :  { %v250_v39 = vmul.f32 %v1875_v38, %v1873_v33  ;;  %v1015_v40 = vpop.permute.xlu1 %1014  ;;  %v1877_v6 = vpop.eup %1876 }
 0x39c   :  { %1796 = vmatmul.mubr.msk.f32.vlgmr.msra.gmra.mrb[8].mxu0 %vm164_vm2, %v1015_v40  ;;  %v579_v10 = vsel %vm164_vm2, %v1877_v6, 0.0 }
 0x39d   :  { %251 = vst.msk [vmem:[#allocation8] sm:$0xff] %vm164_vm2, %v250_v39  ;;  %1751 = vmatmul.mubr.msk.f32.vlgmr.msra.gmra.mrb[2].mxu1 %vm164_vm2, %v250_v39  ;;  %1805 = vmatprep.mubr.msk.f32.mxu0 %vm2028_vm1, %v2027_v8 }
 0x39e   :  { %1754 = vmatpush3.xpose.msk.msra.mxu1 %vm164_vm2, %v331_v17  ;;  %1755 = vmatprep.mubr.msk.f32.mxu1 %vm2028_vm1, %v2027_v8 }
 0x39f   :  { %v1184_v41 = vpop.permute.xlu1 %1183  ;;  %1758 = vmatprep.subr.mxu1 %v2027_v8 }
 0x3a0   :  { %1804 = vmatpush3.xpose.msk.msra.mxu0 %vm164_vm2, %v1184_v41 }
 0x3a1   :  { %1756 = vmatmul.mubr.msk.f32.vlgmr.msra.gmra.mrb[4].mxu1 %vm164_vm2, %v329_v18  ;;  %1813 = vmatprep.subr.mxu0 %v2027_v8 }
 0x3a2   :  { %1760 = vmatprep.mubr.msk.f32.mxu1 %vm2028_vm1, %v2027_v8 }
 0x3a3   :  { %v1351_v43 = vpop.permute.xlu1 %1350  ;;  %1806 = vmatmul.mubr.msk.f32.vlgmr.msra.gmra.mrb[10].mxu0 %vm164_vm2, %v1182_v42 }
 0x3a4   :  { %1814 = vmatpush3.xpose.msk.msra.mxu0 %vm164_vm2, %v1351_v43  ;;  %1815 = vmatprep.mubr.msk.f32.mxu0 %vm2028_vm1, %v2027_v8 }
 0x3a7   :  { %1816 = vmatmul.mubr.msk.f32.vlgmr.msra.gmra.mrb[12].mxu0 %vm164_vm2, %v1349_v44 }
 0x3cc   :  { %v736_v45 = vpop.f32.mrb[4].mxu0 }
 0x3cd   :  { %v1777_v46 = vpop.f32.mrb[5].mxu0  ;;  %v740_v47 = vsel %vm164_vm2, %v736_v45, -inf }
 0x3ce   :  { %741 = vmax.xlane.f32.xlu0 %v740_v47 }
 0x45b   :  { %v742_v49 = vpop.xlane.xlu0 %741 }
 0x45c   :  { %v743_v53 = vsub.f32 %v736_v45, %v742_v49 }
 0x45e   :  { %v744_v56 = vmul.f32 1.442695, %v743_v53 }
 0x460   :  { %1878 = vpow2.f32 %v744_v56 }
 0x46a   :  { %v921_v51 = vpop.f32.mrb[6].mxu0  ;;  %v1879_v9 = vpop.eup %1878 }
 0x46b   :  { %v1787_v52 = vpop.f32.mrb[7].mxu0  ;;  %v925_v2 = vsel %vm164_vm2, %v921_v51, -inf  ;;  %v746_v12 = vsel %vm164_vm2, %v1879_v9, 0.0 }
 0x46f   :  { %v1088_v55 = vpop.f32.mrb[8].mxu0 }
 0x470   :  { %v2216_v57 = vpop.f32.mrb[2].mxu1  ;;  %v1797_v58 = vpop.f32.mrb[9].mxu0  ;;  %v1092_v59 = vsel %vm164_vm2, %v1088_v55, -inf }
 0x471   :  { %1093 = vmax.xlane.f32.xlu0 %v1092_v59  ;;  %v1752_v60 = vpop.f32.mrb[3].mxu1 }
 0x474   :  { %v2219_v61 = vpop.f32.mrb[4].mxu1 }
 0x475   :  { %v1757_v62 = vpop.f32.mrb[5].mxu1  ;;  %v406_v63 = vsel %vm164_vm2, %v2219_v61, -inf }
 0x476   :  { %v1255_v0 = vpop.f32.mrb[10].mxu0  ;;  %407 = vmax.xlane.f32.xlu1 %v406_v63 }
 0x477   :  { %v1807_v1 = vpop.f32.mrb[11].mxu0  ;;  %v1259_v7 = vsel %vm164_vm2, %v1255_v0, -inf }
 0x47a   :  { %v1422_v3 = vpop.f32.mrb[12].mxu0  ;;  %926 = vmax.xlane.f32.xlu1 %v925_v2 }
 0x47b   :  { %v1817_v4 = vpop.f32.mrb[13].mxu0  ;;  %v1426_v5 = vsel %vm164_vm2, %v1422_v3, -inf }
 0x47c   :  { %1427 = vmax.xlane.f32.xlu0 %v1426_v5  ;;  %v1530_v4 = vld [vmem:[#allocation7] sm:$0xff]  ;;  %v1531_v5 = vld [vmem:[#allocation7 + $0x8] sm:$0xff] }
 0x47e   :  { %1260 = vmax.xlane.f32.xlu1 %v1259_v7  ;;  %v1842_v7 = vpack.c.bf16 %v1531_v5, %v1530_v4 }
 0x480   :  { %580 = vadd.xlane.f32.xlu0 %v579_v10  ;;  %1843 = vmatprep.subr.bf16.mxu0 %v1842_v7  ;;  %v1532_v10 = vld [vmem:[#allocation7 + $0x10] sm:$0xff] }
 0x481   :  { %1845 = vmatpush3.bf16.msra.mxu0 %v1842_v7 }
 0x482   :  { %747 = vadd.xlane.f32.xlu1 %v746_v12  ;;  %v1533_v12 = vld [vmem:[#allocation7 + $0x18] sm:$0xff] }
 0x4fe   :  { %v1094_v14 = vpop.xlane.xlu0 %1093 }
 0x4ff   :  { %v1095_v15 = vsub.f32 %v1088_v55, %v1094_v14 }
 0x501   :  { %v1096_v16 = vmul.f32 1.442695, %v1095_v15  ;;  %v1846_v15 = vpack.c.bf16 %v1533_v12, %v1532_v10 }
 0x503   :  { %1880 = vpow2.f32 %v1096_v16  ;;  %v408_v17 = vpop.xlane.xlu1 %407  ;;  %1847 = vmatprep.subr.bf16.mxu0 %v1846_v15 }
 0x504   :  { %v409_v41 = vsub.f32 %v2219_v61, %v408_v17  ;;  %1849 = vmatpush3.bf16.msra.mxu0 %v1846_v15 }
 0x506   :  { %v410_v42 = vmul.f32 1.442695, %v409_v41 }
 0x507   :  { %v927_v18 = vpop.xlane.xlu1 %926 }
 0x508   :  { %v928_v19 = vsub.f32 %v921_v51, %v927_v18 }
 0x509   :  { %v1428_v20 = vpop.xlane.xlu0 %1427 }
 0x50a   :  { %v929_v21 = vmul.f32 1.442695, %v928_v19  ;;  %v1429_v22 = vsub.f32 %v1422_v3, %v1428_v20 }
 0x50b   :  { %v1261_v23 = vpop.xlane.xlu1 %1260 }
 0x50c   :  { %1882 = vpow2.f32 %v929_v21  ;;  %v1430_v24 = vmul.f32 1.442695, %v1429_v22  ;;  %v1262_v25 = vsub.f32 %v1255_v0, %v1261_v23 }
 0x50d   :  { %v1881_v26 = vpop.eup %1880  ;;  %v581_v27 = vpop.xlane.xlu0 %580 }
 0x50e   :  { %1884 = vpow2.f32 %v1430_v24  ;;  %v1263_v28 = vmul.f32 1.442695, %v1262_v25  ;;  %v1098_v29 = vsel %vm164_vm2, %v1881_v26, 0.0 }
 0x50f   :  { %1886 = vrcp.f32 %v581_v27  ;;  %1099 = vadd.xlane.f32.xlu1 %v1098_v29  ;;  %v748_v30 = vpop.xlane.xlu1 %747 }
 0x510   :  { %1888 = vpow2.f32 %v1263_v28 }
 0x511   :  { %1890 = vrcp.f32 %v748_v30 }
 0x512   :  { %1892 = vpow2.f32 %v410_v42 }
 0x516   :  { %v1883_v31 = vpop.eup %1882 }
 0x517   :  { %v931_v32 = vsel %vm164_vm2, %v1883_v31, 0.0 }
 0x518   :  { %v1885_v33 = vpop.eup %1884  ;;  %932 = vadd.xlane.f32.xlu0 %v931_v32 }
 0x519   :  { %v1887_v34 = vpop.eup %1886  ;;  %v1432_v35 = vsel %vm164_vm2, %v1885_v33, 0.0 }
 0x51a   :  { %v1889_v36 = vpop.eup %1888  ;;  %v583_v37 = vmul.f32 %v1887_v34, %v1877_v6  ;;  %1433 = vadd.xlane.f32.xlu1 %v1432_v35 }
 0x51b   :  { %v1891_v38 = vpop.eup %1890  ;;  %v1265_v39 = vsel %vm164_vm2, %v1889_v36, 0.0 }
 0x51c   :  { %585 = vst.msk [vmem:[#allocation8 + $0x10] sm:$0xff] %vm164_vm2, %v583_v37  ;;  %v750_v40 = vmul.f32 %v1891_v38, %v1879_v9  ;;  %1266 = vadd.xlane.f32.xlu0 %v1265_v39  ;;  %v1893_v43 = vpop.eup %1892 }
 0x51d   :  { %v412_v44 = vsel %vm164_vm2, %v1893_v43, 0.0 }
 0x51e   :  { %752 = vst.msk [vmem:[#allocation8 + $0x18] sm:$0xff] %vm164_vm2, %v750_v40 }
 0x52b   :  { %586 = vrot.lane.b32.xlu1 %v2144_v13, %s2037_s19 }
 0x532   :  { %419 = vrot.lane.b32.xlu0 %v2144_v13, %s2038_s20 }
 0x536   :  { %938 = vrot.lane.b32.xlu0 %v2142_v11, %s2029_s12 }
 0x53a   :  { %1272 = vrot.lane.b32.xlu0 %v2142_v11, %s2037_s19 }
 0x54f   :  { %413 = vadd.xlane.f32.xlu1 %v412_v44 }
 0x560   :  { %753 = vrot.lane.b32.xlu1 %v2144_v13, %s2039_s1 }
 0x564   :  { %1105 = vrot.lane.b32.xlu1 %v2142_v11, %s2038_s20 }
 0x568   :  { %1439 = vrot.lane.b32.xlu1 %v2142_v11, %s2039_s1 }
 0x59c   :  { %v1100_v45 = vpop.xlane.xlu1 %1099 }
 0x59d   :  { %1894 = vrcp.f32 %v1100_v45 }
 0x5a5   :  { %v933_v46 = vpop.xlane.xlu0 %932 }
 0x5a6   :  { %1896 = vrcp.f32 %v933_v46 }
 0x5a7   :  { %v1895_v47 = vpop.eup %1894  ;;  %v1434_v48 = vpop.xlane.xlu1 %1433 }
 0x5a8   :  { %v1102_v49 = vmul.f32 %v1895_v47, %v1881_v26  ;;  %1898 = vrcp.f32 %v1434_v48 }
 0x5a9   :  { %v1267_v50 = vpop.xlane.xlu0 %1266 }
 0x5aa   :  { %1104 = vst.msk [vmem:[#allocation8 + $0x28] sm:$0xff] %vm164_vm2, %v1102_v49  ;;  %1900 = vrcp.f32 %v1267_v50 }
 0x5ab   :  { %v587_v56 = vpop.permute.xlu1 %586 }
 0x5ad   :  { %v420_v51 = vpop.permute.xlu0 %419 }
 0x5ae   :  { %1759 = vmatpush3.msra.mxu1 %v420_v51 }
 0x5af   :  { %1768 = vmatprep.subr.mxu1 %v2027_v8 }
 0x5b0   :  { %v1897_v13 = vpop.eup %1896 }
 0x5b1   :  { %v935_v52 = vmul.f32 %v1897_v13, %v1883_v31  ;;  %v939_v62 = vpop.permute.xlu0 %938 }
 0x5b2   :  { %v1899_v53 = vpop.eup %1898 }
 0x5b3   :  { %937 = vst.msk [vmem:[#allocation8 + $0x20] sm:$0xff] %vm164_vm2, %v935_v52  ;;  %v1436_v11 = vmul.f32 %v1899_v53, %v1885_v33 }
 0x5b4   :  { %v1901_v54 = vpop.eup %1900 }
 0x5b5   :  { %1438 = vst.msk [vmem:[#allocation8 + $0x38] sm:$0xff] %vm164_vm2, %v1436_v11  ;;  %v1269_v55 = vmul.f32 %v1901_v54, %v1889_v36  ;;  %v1273_v0 = vpop.permute.xlu0 %1272 }
 0x5b7   :  { %1271 = vst.msk [vmem:[#allocation8 + $0x30] sm:$0xff] %vm164_vm2, %v1269_v55 }
 0x5dc   :  { %v414_v58 = vpop.xlane.xlu1 %413 }
 0x5dd   :  { %1902 = vrcp.f32 %v414_v58 }
 0x5e0   :  { %v754_v61 = vpop.permute.xlu1 %753 }
 0x5e4   :  { %v1106_v63 = vpop.permute.xlu1 %1105 }
 0x5e7   :  { %v1903_v59 = vpop.eup %1902 }
 0x5e8   :  { %v416_v60 = vmul.f32 %v1903_v59, %v1893_v43  ;;  %v1440_v1 = vpop.permute.xlu1 %1439 }
 0x5ea   :  { %418 = vst.msk [vmem:[#allocation8 + $0x8] sm:$0xff] %vm164_vm2, %v416_v60  ;;  %1761 = vmatmul.mubr.msk.f32.vlgmr.msra.gmra.mrb[6].mxu1 %vm164_vm2, %v416_v60 }
 0x5eb   :  { %1769 = vmatpush3.msra.mxu1 %v587_v56  ;;  %1770 = vmatprep.mubr.msk.f32.mxu1 %vm2028_vm1, %v2027_v8 }
 0x5ec   :  { %1778 = vmatprep.subr.mxu1 %v2027_v8 }
 0x5ee   :  { %1771 = vmatmul.mubr.msk.f32.vlgmr.msra.gmra.mrb[8].mxu1 %vm164_vm2, %v583_v37 }
 0x5ef   :  { %1779 = vmatpush3.msra.mxu1 %v754_v61  ;;  %1780 = vmatprep.mubr.msk.f32.mxu1 %vm2028_vm1, %v2027_v8 }
 0x5f0   :  { %1788 = vmatprep.subr.mxu1 %v2027_v8 }
 0x5f2   :  { %1781 = vmatmul.mubr.msk.f32.vlgmr.msra.gmra.mrb[10].mxu1 %vm164_vm2, %v750_v40 }
 0x5f3   :  { %1789 = vmatpush3.msra.mxu1 %v939_v62  ;;  %1790 = vmatprep.mubr.msk.f32.mxu1 %vm2028_vm1, %v2027_v8 }
 0x5f4   :  { %1798 = vmatprep.subr.mxu1 %v2027_v8 }
 0x5f6   :  { %1791 = vmatmul.mubr.msk.f32.vlgmr.msra.gmra.mrb[12].mxu1 %vm164_vm2, %v935_v52 }
 0x5f7   :  { %1799 = vmatpush3.msra.mxu1 %v1106_v63  ;;  %1800 = vmatprep.mubr.msk.f32.mxu1 %vm2028_vm1, %v2027_v8 }
 0x5f8   :  { %1808 = vmatprep.subr.mxu1 %v2027_v8 }
 0x5fa   :  { %1801 = vmatmul.mubr.msk.f32.vlgmr.msra.gmra.mrb[14].mxu1 %vm164_vm2, %v1102_v49 }
 0x5fb   :  { %1809 = vmatpush3.msra.mxu1 %v1273_v0  ;;  %1810 = vmatprep.mubr.msk.f32.mxu1 %vm2028_vm1, %v2027_v8 }
 0x5fc   :  { %1818 = vmatprep.subr.mxu1 %v2027_v8 }
 0x5fe   :  { %1811 = vmatmul.mubr.msk.f32.vlgmr.msra.gmra.mrb[16].mxu1 %vm164_vm2, %v1269_v55 }
 0x5ff   :  { %1819 = vmatpush3.msra.mxu1 %v1440_v1  ;;  %1820 = vmatprep.mubr.msk.f32.mxu1 %vm2028_vm1, %v2027_v8 }
 0x602   :  { %1821 = vmatmul.mubr.msk.f32.vlgmr.msra.gmra.mrb[18].mxu1 %vm164_vm2, %v1436_v11 }
 0x6bd   :  { %v491_v2 = vpop.f32.mrb[6].mxu1 }
 0x6be   :  { %830 = vrot.lane.b32.xlu0 %v491_v2, %s2025_s10  ;;  %v1762_v3 = vpop.f32.mrb[7].mxu1 }
 0x6c1   :  { %v658_v6 = vpop.f32.mrb[8].mxu1 }
 0x6c2   :  { %834 = vrot.lane.b32.xlu1 %v658_v6, %s2040_s21  ;;  %v1772_v9 = vpop.f32.mrb[9].mxu1 }
 0x6c5   :  { %v825_v14 = vpop.f32.mrb[10].mxu1 }
 0x6c6   :  { %838 = vrot.lane.b32.xlu1 %v825_v14, %s2041_s22  ;;  %v1782_v8 = vpop.f32.mrb[11].mxu1 }
 0x6c9   :  { %v1010_v16 = vpop.f32.mrb[12].mxu1 }
 0x6ca   :  { %v1792_v17 = vpop.f32.mrb[13].mxu1 }
 0x6cd   :  { %v1177_v18 = vpop.f32.mrb[14].mxu1 }
 0x6ce   :  { %1516 = vrot.lane.b32.xlu0 %v1177_v18, %s2025_s10  ;;  %v1802_v19 = vpop.f32.mrb[15].mxu1 }
 0x6d1   :  { %v1344_v20 = vpop.f32.mrb[16].mxu1 }
 0x6d2   :  { %1520 = vrot.lane.b32.xlu0 %v1344_v20, %s2040_s21  ;;  %v1812_v21 = vpop.f32.mrb[17].mxu1 }
 0x6d5   :  { %v1511_v22 = vpop.f32.mrb[18].mxu1 }
 0x6d6   :  { %1524 = vrot.lane.b32.xlu1 %v1511_v22, %s2041_s22  ;;  %v1822_v23 = vpop.f32.mrb[19].mxu1 }
 0x730   :  { %v831_v24 = vpop.permute.xlu0 %830 }
 0x731   :  { %v841_v26 = vsel %vm164_vm2, %v2216_v57, %v831_v24 }
 0x734   :  { %v835_v25 = vpop.permute.xlu1 %834 }
 0x735   :  { %v843_v27 = vsel %vm842_vm3, %v841_v26, %v835_v25 }
 0x738   :  { %v839_v28 = vpop.permute.xlu1 %838 }
 0x739   :  { %v845_v29 = vsel %vm844_vm4, %v843_v27, %v839_v28 }
 0x73a   :  { %1831 = vmatprep.mubr.msk.f32.mxu0 %vm78_vm0, %v845_v29 }
 0x740   :  { %v1517_v30 = vpop.permute.xlu0 %1516 }
 0x741   :  { %v1527_v32 = vsel %vm164_vm2, %v1010_v16, %v1517_v30 }
 0x744   :  { %v1521_v31 = vpop.permute.xlu0 %1520 }
 0x745   :  { %v1528_v33 = vsel %vm842_vm3, %v1527_v32, %v1521_v31 }
 0x748   :  { %v1525_v34 = vpop.permute.xlu1 %1524 }
 0x749   :  { %v1529_v35 = vsel %vm844_vm4, %v1528_v33, %v1525_v34 }
 0x74a   :  { %1832 = vmatmul.mubr.msk.f32.vlgmr.msra.gmra.mrb[14].mxu0 %vm78_vm0, %v1529_v35 }
 0x74b   :  { %1981 = shalt.err (!%p1978_p0)
}
 0x74c   :  { %s1982_s29 = scalar_lea.hbm %s2321_s5, 1024 }
 0x74d   :  { %p1983_p1 = scmp.ne.s32.totalorder %s2321_s5, %s1982_s29  ;;  %p1986_p2 = scmp.lt.u32.totalorder %s1982_s29, %s2321_s5 }
 0x74f   :  { %p1988_p3 = pnand %p1986_p2, %p1983_p1 }
 0x751   :  { %1991 = shalt.err (!%p1988_p3)
}
 0x752   :  { %1635 = dma.vmem_to_hbm [thread:$0]  %s1630_s25, 1024, %s2321_s5, [#allocation4], %s2024_s9, %s2024_s9, %s2025_s10  }
 0x753   :  { %v1685_v57 = vld [vmem:[%s2320_s4] ss:$0 sm:$0xff]  ;;  %s2043_s13 = smov [#allocation9]  }
 0x754   :  { %s1641_s14 = sshll.u32 %s2043_s13, 4  ;;  %s1642_s14 = int_to_ptr.vmem [resolvable:$true] %s1641_s14 }
 0x755   :  { %s1992_s2 = scalar_lea.vmem %s1642_s14, 256  ;;  %p1997_p5 = scmp.lt.s32.totalorder %s1642_s14, %s1642_s14 }
 0x756   :  { %p1993_p4 = scmp.ne.s32.totalorder %s1642_s14, %s1992_s2  ;;  %p1998_p6 = scmp.lt.s32.totalorder %s1992_s2, %s1992_s2 }
 0x758   :  { %p1999_p7 = por %p1998_p6, %p1997_p5 }
 0x75a   :  { %p2000_p8 = pnand %p1999_p7, %p1993_p4 }
 0x81d   :  { %v1833_v36 = vpop.f32.mrb[14].mxu0 }
 0x81e   :  { %v1619_v37 = vadd.f32 %v1833_v36, %v1685_v57  ;;  %v1613_v38 = vpop.f32.mrb[15].mxu0 }
 0x81f   :  { %v1614_v39 = vadd.f32 %v1685_v57, %v1613_v38 }
 0x820   :  { %1623 = vst.msk [vmem:[#allocation9 + $0x8] sm:$0xff] %vm78_vm0, %v1619_v37 }
 0x821   :  { %1622 = vst.msk [vmem:[#allocation9] sm:$0xff] %vm78_vm0, %v1614_v39 }
 0x822   :  { %2003 = shalt.err (!%p2000_p8)
}
 0x823   :  { %s2004_s15 = scalar_lea.hbm %s2322_s6, 256 }
 0x824   :  { %p2005_p9 = scmp.ne.s32.totalorder %s2322_s6, %s2004_s15  ;;  %p2008_p10 = scmp.lt.u32.totalorder %s2004_s15, %s2322_s6 }
 0x826   :  { %p2010_p11 = pnand %p2008_p10, %p2005_p9 }
 0x828   :  { %2013 = shalt.err (!%p2010_p11)
}
 0x829   :  { %1647 = dma.vmem_to_hbm [thread:$0]  %s1642_s14, 256, %s2322_s6, [#allocation10], %s2024_s9, %s2024_s9, %s2025_s10  }
 0x82a   :  { %2018 = dma.done.wait [#allocation4], 1024  }
 0x82b   :  { %2019 = vsyncadd [#allocation4], 4294966272 }
 0x82c   :  { %2020 = dma.done.wait [#allocation10], 256  }
 0x82d   :  { %2021 = vsyncadd [#allocation10], 4294967040 }
 0x82e   :  { %1654 = vsyncpa [#allocation3], 1 }
 0x82f   :  { %1655 = vsyncpa [#allocation6], 1 }
 0x830   :  { %1656 = vsyncpa [#allocation4], 1 }
 0x831   :  { %1657 = vsyncpa [#allocation10], 1 }

</bundles_post_ra>
